<compile_context>
chip_gen: v5e
topology: v5e:2x2
jax: 0.10.0
libtpu: 0.0.40
codegen_flags: <defaults>
</compile_context>

<pallas_src>
import functools

import jax
import jax.numpy as jnp
from jax import lax
from jax.experimental import pallas as pl
from jax.experimental.pallas import tpu as pltpu

SUB = 8      # f32 sublane tile
LANE = 128   # lane tile


def _up(n, m):
    return ((n + m - 1) // m) * m


def _layout(K, D, C, H):
    """Row offsets of each parameter block inside the packed (rows, lanes) slab."""
    lanes = _up(max(C, 4 * H), LANE)
    tap_stride = _up(D, SUB)
    offs = {}
    r = 0
    offs["conv"] = r;  r += K * tap_stride      # K conv taps, (D, C) each, 8-aligned
    offs["convb"] = r; r += SUB                 # (1, C)
    offs["wih"] = r;   r += _up(C, SUB)         # (C, 4H), gate cols permuted [i,f,o|g]
    offs["whh"] = r;   r += _up(H, SUB)         # (H, 4H), same permutation
    offs["bias"] = r;  r += SUB                 # (1, 4H)  b_ih + b_hh, permuted
    offs["fcw"] = r;   r += SUB                 # (1, H)
    offs["fcb"] = r;   r += SUB                 # (1, 1)
    return offs, _up(r, SUB), lanes, tap_stride


def pack_params(params):
    """One-time parameter packing (do NOT call per forward).

    Gate permutation, transposes and conv-weight flattening happen here, and
    everything is packed into one lane-dense f32 slab so the kernel sees only
    two operands (activations + weights)."""
    conv_w = jnp.asarray(params["conv_w"], jnp.float32)   # (C, D, K)
    conv_b = jnp.asarray(params["conv_b"], jnp.float32)   # (C,)
    w_ih = jnp.asarray(params["w_ih"], jnp.float32)       # (4H, C) torch order i,f,g,o
    w_hh = jnp.asarray(params["w_hh"], jnp.float32)       # (4H, H)
    b_ih = jnp.asarray(params["b_ih"], jnp.float32)       # (4H,)
    b_hh = jnp.asarray(params["b_hh"], jnp.float32)       # (4H,)
    fc_w = jnp.asarray(params["fc_w"], jnp.float32)       # (1, H)
    fc_b = jnp.asarray(params["fc_b"], jnp.float32)       # (1,)

    C, D, K = conv_w.shape
    H = w_hh.shape[1]
    offs, rows, lanes, tap_stride = _layout(K, D, C, H)

    # gate-column permutation: torch [i, f, g, o] -> [i, f, o | g]
    perm = jnp.concatenate([jnp.arange(0, 2 * H),
                            jnp.arange(3 * H, 4 * H),
                            jnp.arange(2 * H, 3 * H)])

    wpack = jnp.zeros((rows, lanes), jnp.float32)
    for k in range(K):                                     # conv tap k -> (D, C)
        r0 = offs["conv"] + k * tap_stride
        wpack = wpack.at[r0:r0 + D, :C].set(conv_w[:, :, k].T)
    wpack = wpack.at[offs["convb"], :C].set(conv_b)
    wpack = wpack.at[offs["wih"]:offs["wih"] + C, :4 * H].set(w_ih.T[:, perm])
    wpack = wpack.at[offs["whh"]:offs["whh"] + H, :4 * H].set(w_hh.T[:, perm])
    wpack = wpack.at[offs["bias"], :4 * H].set((b_ih + b_hh)[perm])
    wpack = wpack.at[offs["fcw"], :H].set(fc_w[0])
    wpack = wpack.at[offs["fcb"], 0].set(fc_b[0])
    return {"wpack": wpack, "K": K, "D": D, "C": C, "H": H}


def cnn_rnn_kernel(x_ref, w_ref, o_ref, gates_ref, *, K, D, C, H, L, BT,
                   offs, tap_stride):
    # x_ref:     (T, BT, D)    time-major input tile (one batch tile)
    # w_ref:     (rows, lanes) packed parameter slab
    # o_ref:     (BT, 1)
    # gates_ref: (L*BT, 4H)    VMEM scratch for the hoisted input projection
    x = x_ref[...]

    # --- Conv1d (VALID) + ReLU: K accumulated tap-matmuls (in-kernel im2col) --
    conv = w_ref[offs["convb"]:offs["convb"] + 1, :C]            # bias (1, C)
    for k in range(K):
        xk = x[k:k + L].reshape(L * BT, D)                       # static slice
        r0 = offs["conv"] + k * tap_stride
        conv = conv + jnp.dot(xk, w_ref[r0:r0 + D, :C],
                              preferred_element_type=jnp.float32)
    conv = jnp.maximum(conv, 0.0)                                # (L*BT, C)

    # --- Hoisted LSTM input projection for all timesteps (one matmul) --------
    wih = w_ref[offs["wih"]:offs["wih"] + C, :4 * H]
    bias = w_ref[offs["bias"]:offs["bias"] + 1, :4 * H]
    gates_ref[...] = (jnp.dot(conv, wih, preferred_element_type=jnp.float32)
                      + bias)

    # --- LSTM recurrence: stream gates from VMEM scratch, flat vreg pressure --
    # TODO(synk): keep W_hh staged in MXU weight registers across the steps via
    # pltpu.matmul_push_rhs / matmul_acc_lhs / matmul_pop; kept as jnp.dot here
    # to keep lowering risk at zero.
    w_hh = w_ref[offs["whh"]:offs["whh"] + H, :4 * H]

    def step(t, carry):
        h, c = carry
        row = pl.multiple_of(t * BT, SUB)
        gx = gates_ref[pl.ds(row, BT), :]                        # (BT, 4H)
        g_all = gx + jnp.dot(h, w_hh, preferred_element_type=jnp.float32)
        sig = jax.nn.sigmoid(g_all[:, :3 * H])                   # [i, f, o] at once
        i = sig[:, :H]
        f = sig[:, H:2 * H]
        o = sig[:, 2 * H:3 * H]
        g = jnp.tanh(g_all[:, 3 * H:])
        c = f * c + i * g
        h = o * jnp.tanh(c)
        return h, c

    h0 = jnp.zeros((BT, H), jnp.float32)
    c0 = jnp.zeros((BT, H), jnp.float32)
    h, _ = lax.fori_loop(0, L, step, (h0, c0), unroll=True)

    # --- output head: fc_out(relu(h_last)) as VPU multiply + lane reduction ---
    fcw = w_ref[offs["fcw"]:offs["fcw"] + 1, :H]                 # (1, H)
    fcb = w_ref[offs["fcb"]:offs["fcb"] + 1, :1]                 # (1, 1)
    out = jnp.sum(jnp.maximum(h, 0.0) * fcw, axis=-1, keepdims=True) + fcb
    o_ref[...] = out.astype(o_ref.dtype)


def cnn_rnn_forward(x, packed):
    """x: (N, T, D) batch-first; packed: output of pack_params (done once)."""
    wpack = packed["wpack"]
    K, D, C, H = packed["K"], packed["D"], packed["C"], packed["H"]
    offs, rows, lanes, tap_stride = _layout(K, D, C, H)

    N, T, Din = x.shape
    assert Din == D
    L = T - K + 1

    BT = min(128, _up(N, SUB))            # batch tile (multiple of sublane width)
    N_pad = _up(N, BT)
    grid = (N_pad // BT,)

    x_tm = jnp.transpose(x, (1, 0, 2)).astype(jnp.float32)       # (T, N, D)
    if N_pad != N:
        x_tm = jnp.pad(x_tm, ((0, 0), (0, N_pad - N), (0, 0)))

    flops = (2 * L * N_pad * K * D * C          # conv taps
             + 2 * L * N_pad * C * 4 * H        # input projection
             + 2 * L * N_pad * H * 4 * H        # recurrence matmuls
             + 10 * L * N_pad * H               # cell elementwise
             + 2 * N_pad * H)                   # head
    transcendentals = 5 * L * N_pad * H
    bytes_accessed = 4 * (int(x_tm.size) + int(wpack.size) + N_pad)

    kernel = functools.partial(
        cnn_rnn_kernel, K=K, D=D, C=C, H=H, L=L, BT=BT,
        offs=offs, tap_stride=tap_stride)

    out = pl.pallas_call(
        kernel,
        out_shape=jax.ShapeDtypeStruct((N_pad, 1), jnp.float32),
        grid=grid,
        in_specs=[
            pl.BlockSpec((T, BT, D), lambda b: (0, b, 0)),
            pl.BlockSpec((rows, lanes), lambda b: (0, 0)),
        ],
        out_specs=pl.BlockSpec((BT, 1), lambda b: (b, 0)),
        scratch_shapes=[pltpu.VMEM((L * BT, 4 * H), jnp.float32)],
        compiler_params=pltpu.CompilerParams(
            dimension_semantics=("parallel",)),
        cost_estimate=pl.CostEstimate(
            flops=flops, transcendentals=transcendentals,
            bytes_accessed=bytes_accessed),
    )(x_tm, wpack)
    return out[:N]


def reference_forward(x, params):
    """Pure-JAX replica of CNNRNNTorch.forward (dim_fc=None) for checking."""
    conv_w, conv_b = params["conv_w"], params["conv_b"]
    w_ih, w_hh = params["w_ih"], params["w_hh"]
    b_ih, b_hh = params["b_ih"], params["b_hh"]
    fc_w, fc_b = params["fc_w"], params["fc_b"]
    H = w_hh.shape[1]
    N = x.shape[0]

    xc = jnp.transpose(x, (0, 2, 1))                            # (N, D, T)
    out = lax.conv_general_dilated(
        xc, conv_w, window_strides=(1,), padding="VALID",
        dimension_numbers=("NCH", "OIH", "NCH"))                # (N, C, L)
    out = jax.nn.relu(out + conv_b[None, :, None])
    seq = jnp.transpose(out, (2, 0, 1))                         # (L, N, C)

    def step(carry, x_t):
        h, c = carry
        gates = x_t @ w_ih.T + h @ w_hh.T + b_ih + b_hh
        i, f, g, o = jnp.split(gates, 4, axis=-1)
        i, f, o = jax.nn.sigmoid(i), jax.nn.sigmoid(f), jax.nn.sigmoid(o)
        g = jnp.tanh(g)
        c = f * c + i * g
        h = o * jnp.tanh(c)
        return (h, c), None

    init = (jnp.zeros((N, H), jnp.float32), jnp.zeros((N, H), jnp.float32))
    (h_last, _), _ = lax.scan(step, init, seq)
    return jax.nn.relu(h_last) @ fc_w.T + fc_b


if __name__ == "__main__":
    # Shapes consistent with the module: dim_input=4, n_channels=16,
    # kernel_size=5, dim_recurrent=32, dim_fc=None (default), batch=2, T=16.
    N, T, D = 2, 16, 4
    C, K, H = 16, 5, 32

    key = jax.random.PRNGKey(0)
    ks = jax.random.split(key, 9)
    params = {
        "conv_w": 0.2 * jax.random.normal(ks[0], (C, D, K), jnp.float32),
        "conv_b": 0.1 * jax.random.normal(ks[1], (C,), jnp.float32),
        "w_ih":   0.2 * jax.random.normal(ks[2], (4 * H, C), jnp.float32),
        "w_hh":   0.2 * jax.random.normal(ks[3], (4 * H, H), jnp.float32),
        "b_ih":   0.1 * jax.random.normal(ks[4], (4 * H,), jnp.float32),
        "b_hh":   0.1 * jax.random.normal(ks[5], (4 * H,), jnp.float32),
        "fc_w":   0.2 * jax.random.normal(ks[6], (1, H), jnp.float32),
        "fc_b":   0.1 * jax.random.normal(ks[7], (1,), jnp.float32),
    }
    x = jax.random.normal(ks[8], (N, T, D), jnp.float32)

    packed = pack_params(params)          # one-time parameter packing
    out = jax.block_until_ready(cnn_rnn_forward(x, packed))
    ref = jax.block_until_ready(reference_forward(x, params))

    assert out.shape == (N, 1), out.shape
    assert jnp.allclose(out, ref, atol=1e-4, rtol=1e-4), (out, ref)
    print("KERNEL_OK")
</pallas_src>

<mosaic_0001>
module attributes {stable_mosaic.version = 11 : i64} {
  func.func @cnn_rnn_kernel(%arg0: i32, %arg1: memref<16x8x4xf32, #tpu.memory_space<vmem>>, %arg2: memref<120x128xf32, #tpu.memory_space<vmem>>, %arg3: memref<8x1xf32, #tpu.memory_space<vmem>>, %arg4: memref<96x128xf32, #tpu.memory_space<vmem>>) attributes {dimension_semantics = [#tpu.dimension_semantics<parallel>], iteration_bounds = array<i64: 1>, scalar_prefetch = 0 : i64, scratch_operands = 1 : i64, tpu.core_type = #tpu.core_type<tc>, window_params = [{transform_indices = @transform_0, window_bounds = array<i64: 16, 8, 4>}, {pipeline_mode = #tpu.pipeline_mode<synchronous>, transform_indices = @transform_1, window_bounds = array<i64: 120, 128>}, {transform_indices = @transform_2, window_bounds = array<i64: 8, 1>}]} {
    %c0 = arith.constant 0 : index
    %c0_0 = arith.constant 0 : index
    %c0_1 = arith.constant 0 : index
    %0 = vector.load %arg1[%c0, %c0_0, %c0_1] : memref<16x8x4xf32, #tpu.memory_space<vmem>>, vector<16x8x4xf32>
    %c40 = arith.constant 40 : index
    %c0_2 = arith.constant 0 : index
    %1 = vector.load %arg2[%c40, %c0_2] : memref<120x128xf32, #tpu.memory_space<vmem>>, vector<1x16xf32>
    %2 = vector.extract_strided_slice %0 {offsets = [0, 0, 0], sizes = [12, 8, 4], strides = [1, 1, 1]} : vector<16x8x4xf32> to vector<12x8x4xf32>
    %3 = vector.shape_cast %2 : vector<12x8x4xf32> to vector<96x4xf32>
    %c0_3 = arith.constant 0 : index
    %c0_4 = arith.constant 0 : index
    %4 = vector.load %arg2[%c0_3, %c0_4] : memref<120x128xf32, #tpu.memory_space<vmem>>, vector<4x16xf32>
    %cst = arith.constant dense<0.000000e+00> : vector<96x16xf32>
    %5 = tpu.matmul %3, %4, %cst {dimension_numbers = #tpu.dot_dimension_numbers<[1], [0], [0], [1], [0, 0, 1, 1], [], []>} : vector<96x4xf32>, vector<4x16xf32>, vector<96x16xf32> -> vector<96x16xf32>
    %6 = vector.broadcast %1 : vector<1x16xf32> to vector<96x16xf32>
    %7 = arith.addf %6, %5 : vector<96x16xf32>
    %8 = vector.extract_strided_slice %0 {offsets = [1, 0, 0], sizes = [12, 8, 4], strides = [1, 1, 1]} : vector<16x8x4xf32> to vector<12x8x4xf32>
    %9 = vector.shape_cast %8 : vector<12x8x4xf32> to vector<96x4xf32>
    %c8 = arith.constant 8 : index
    %c0_5 = arith.constant 0 : index
    %10 = vector.load %arg2[%c8, %c0_5] : memref<120x128xf32, #tpu.memory_space<vmem>>, vector<4x16xf32>
    %cst_6 = arith.constant dense<0.000000e+00> : vector<96x16xf32>
    %11 = tpu.matmul %9, %10, %cst_6 {dimension_numbers = #tpu.dot_dimension_numbers<[1], [0], [0], [1], [0, 0, 1, 1], [], []>} : vector<96x4xf32>, vector<4x16xf32>, vector<96x16xf32> -> vector<96x16xf32>
    %12 = arith.addf %7, %11 : vector<96x16xf32>
    %13 = vector.extract_strided_slice %0 {offsets = [2, 0, 0], sizes = [12, 8, 4], strides = [1, 1, 1]} : vector<16x8x4xf32> to vector<12x8x4xf32>
    %14 = vector.shape_cast %13 : vector<12x8x4xf32> to vector<96x4xf32>
    %c16 = arith.constant 16 : index
    %c0_7 = arith.constant 0 : index
    %15 = vector.load %arg2[%c16, %c0_7] : memref<120x128xf32, #tpu.memory_space<vmem>>, vector<4x16xf32>
    %cst_8 = arith.constant dense<0.000000e+00> : vector<96x16xf32>
    %16 = tpu.matmul %14, %15, %cst_8 {dimension_numbers = #tpu.dot_dimension_numbers<[1], [0], [0], [1], [0, 0, 1, 1], [], []>} : vector<96x4xf32>, vector<4x16xf32>, vector<96x16xf32> -> vector<96x16xf32>
    %17 = arith.addf %12, %16 : vector<96x16xf32>
    %18 = vector.extract_strided_slice %0 {offsets = [3, 0, 0], sizes = [12, 8, 4], strides = [1, 1, 1]} : vector<16x8x4xf32> to vector<12x8x4xf32>
    %19 = vector.shape_cast %18 : vector<12x8x4xf32> to vector<96x4xf32>
    %c24 = arith.constant 24 : index
    %c0_9 = arith.constant 0 : index
    %20 = vector.load %arg2[%c24, %c0_9] : memref<120x128xf32, #tpu.memory_space<vmem>>, vector<4x16xf32>
    %cst_10 = arith.constant dense<0.000000e+00> : vector<96x16xf32>
    %21 = tpu.matmul %19, %20, %cst_10 {dimension_numbers = #tpu.dot_dimension_numbers<[1], [0], [0], [1], [0, 0, 1, 1], [], []>} : vector<96x4xf32>, vector<4x16xf32>, vector<96x16xf32> -> vector<96x16xf32>
    %22 = arith.addf %17, %21 : vector<96x16xf32>
    %23 = vector.extract_strided_slice %0 {offsets = [4, 0, 0], sizes = [12, 8, 4], strides = [1, 1, 1]} : vector<16x8x4xf32> to vector<12x8x4xf32>
    %24 = vector.shape_cast %23 : vector<12x8x4xf32> to vector<96x4xf32>
    %c32 = arith.constant 32 : index
    %c0_11 = arith.constant 0 : index
    %25 = vector.load %arg2[%c32, %c0_11] : memref<120x128xf32, #tpu.memory_space<vmem>>, vector<4x16xf32>
    %cst_12 = arith.constant dense<0.000000e+00> : vector<96x16xf32>
    %26 = tpu.matmul %24, %25, %cst_12 {dimension_numbers = #tpu.dot_dimension_numbers<[1], [0], [0], [1], [0, 0, 1, 1], [], []>} : vector<96x4xf32>, vector<4x16xf32>, vector<96x16xf32> -> vector<96x16xf32>
    %27 = arith.addf %22, %26 : vector<96x16xf32>
    %cst_13 = arith.constant 0.000000e+00 : f32
    %28 = vector.broadcast %cst_13 : f32 to vector<96x16xf32>
    %29 = arith.maximumf %27, %28 : vector<96x16xf32>
    %c48 = arith.constant 48 : index
    %c0_14 = arith.constant 0 : index
    %30 = vector.load %arg2[%c48, %c0_14] : memref<120x128xf32, #tpu.memory_space<vmem>>, vector<16x128xf32>
    %c96 = arith.constant 96 : index
    %c0_15 = arith.constant 0 : index
    %31 = vector.load %arg2[%c96, %c0_15] : memref<120x128xf32, #tpu.memory_space<vmem>>, vector<1x128xf32>
    %cst_16 = arith.constant dense<0.000000e+00> : vector<96x128xf32>
    %32 = tpu.matmul %29, %30, %cst_16 {dimension_numbers = #tpu.dot_dimension_numbers<[1], [0], [0], [1], [0, 0, 1, 1], [], []>} : vector<96x16xf32>, vector<16x128xf32>, vector<96x128xf32> -> vector<96x128xf32>
    %33 = vector.broadcast %31 : vector<1x128xf32> to vector<96x128xf32>
    %34 = arith.addf %32, %33 : vector<96x128xf32>
    %c0_17 = arith.constant 0 : index
    %c0_18 = arith.constant 0 : index
    %35 = vector.load %arg4[%c0_17, %c0_18] : memref<96x128xf32, #tpu.memory_space<vmem>>, vector<96x128xf32>
    tpu.vector_store %arg4[%c0_17, %c0_18], %34 {strides = array<i32>} : memref<96x128xf32, #tpu.memory_space<vmem>>, vector<96x128xf32>,
    %c64 = arith.constant 64 : index
    %c0_19 = arith.constant 0 : index
    %36 = vector.load %arg2[%c64, %c0_19] : memref<120x128xf32, #tpu.memory_space<vmem>>, vector<32x128xf32>
    %cst_20 = arith.constant 0.000000e+00 : f32
    %37 = vector.broadcast %cst_20 : f32 to vector<8x32xf32>
    %cst_21 = arith.constant 0.000000e+00 : f32
    %38 = vector.broadcast %cst_21 : f32 to vector<8x32xf32>
    %c0_i32 = arith.constant 0 : i32
    %c8_i32 = arith.constant 8 : i32
    %39 = arith.muli %c0_i32, %c8_i32 : i32
    %40 = tpu.assume_multiple %39, 8 : i32
    %41 = arith.index_cast %40 : i32 to index
    %c0_22 = arith.constant 0 : index
    %42 = vector.load %arg4[%41, %c0_22] : memref<96x128xf32, #tpu.memory_space<vmem>>, vector<8x128xf32>
    %cst_23 = arith.constant dense<0.000000e+00> : vector<8x128xf32>
    %43 = tpu.matmul %37, %36, %cst_23 {dimension_numbers = #tpu.dot_dimension_numbers<[1], [0], [0], [1], [0, 0, 1, 1], [], []>} : vector<8x32xf32>, vector<32x128xf32>, vector<8x128xf32> -> vector<8x128xf32>
    %44 = arith.addf %42, %43 : vector<8x128xf32>
    %45 = vector.extract_strided_slice %44 {offsets = [0, 0], sizes = [8, 96], strides = [1, 1]} : vector<8x128xf32> to vector<8x96xf32>
    %46 = arith.negf %45 : vector<8x96xf32>
    %47 = math.exp %46 : vector<8x96xf32>
    %cst_24 = arith.constant 1.000000e+00 : f32
    %48 = vector.broadcast %cst_24 : f32 to vector<8x96xf32>
    %49 = arith.addf %48, %47 : vector<8x96xf32>
    %50 = arith.divf %48, %49 : vector<8x96xf32>
    %51 = vector.extract_strided_slice %50 {offsets = [0, 0], sizes = [8, 32], strides = [1, 1]} : vector<8x96xf32> to vector<8x32xf32>
    %52 = vector.extract_strided_slice %50 {offsets = [0, 32], sizes = [8, 32], strides = [1, 1]} : vector<8x96xf32> to vector<8x32xf32>
    %53 = vector.extract_strided_slice %50 {offsets = [0, 64], sizes = [8, 32], strides = [1, 1]} : vector<8x96xf32> to vector<8x32xf32>
    %54 = vector.extract_strided_slice %44 {offsets = [0, 96], sizes = [8, 32], strides = [1, 1]} : vector<8x128xf32> to vector<8x32xf32>
    %55 = math.tanh %54 : vector<8x32xf32>
    %56 = arith.mulf %52, %38 : vector<8x32xf32>
    %57 = arith.mulf %51, %55 : vector<8x32xf32>
    %58 = arith.addf %56, %57 : vector<8x32xf32>
    %59 = math.tanh %58 : vector<8x32xf32>
    %60 = arith.mulf %53, %59 : vector<8x32xf32>
    %c1_i32 = arith.constant 1 : i32
    %c8_i32_25 = arith.constant 8 : i32
    %61 = arith.muli %c1_i32, %c8_i32_25 : i32
    %62 = tpu.assume_multiple %61, 8 : i32
    %63 = arith.index_cast %62 : i32 to index
    %c0_26 = arith.constant 0 : index
    %64 = vector.load %arg4[%63, %c0_26] : memref<96x128xf32, #tpu.memory_space<vmem>>, vector<8x128xf32>
    %cst_27 = arith.constant dense<0.000000e+00> : vector<8x128xf32>
    %65 = tpu.matmul %60, %36, %cst_27 {dimension_numbers = #tpu.dot_dimension_numbers<[1], [0], [0], [1], [0, 0, 1, 1], [], []>} : vector<8x32xf32>, vector<32x128xf32>, vector<8x128xf32> -> vector<8x128xf32>
    %66 = arith.addf %64, %65 : vector<8x128xf32>
    %67 = vector.extract_strided_slice %66 {offsets = [0, 0], sizes = [8, 96], strides = [1, 1]} : vector<8x128xf32> to vector<8x96xf32>
    %68 = arith.negf %67 : vector<8x96xf32>
    %69 = math.exp %68 : vector<8x96xf32>
    %cst_28 = arith.constant 1.000000e+00 : f32
    %70 = vector.broadcast %cst_28 : f32 to vector<8x96xf32>
    %71 = arith.addf %70, %69 : vector<8x96xf32>
    %72 = arith.divf %70, %71 : vector<8x96xf32>
    %73 = vector.extract_strided_slice %72 {offsets = [0, 0], sizes = [8, 32], strides = [1, 1]} : vector<8x96xf32> to vector<8x32xf32>
    %74 = vector.extract_strided_slice %72 {offsets = [0, 32], sizes = [8, 32], strides = [1, 1]} : vector<8x96xf32> to vector<8x32xf32>
    %75 = vector.extract_strided_slice %72 {offsets = [0, 64], sizes = [8, 32], strides = [1, 1]} : vector<8x96xf32> to vector<8x32xf32>
    %76 = vector.extract_strided_slice %66 {offsets = [0, 96], sizes = [8, 32], strides = [1, 1]} : vector<8x128xf32> to vector<8x32xf32>
    %77 = math.tanh %76 : vector<8x32xf32>
    %78 = arith.mulf %74, %58 : vector<8x32xf32>
    %79 = arith.mulf %73, %77 : vector<8x32xf32>
    %80 = arith.addf %78, %79 : vector<8x32xf32>
    %81 = math.tanh %80 : vector<8x32xf32>
    %82 = arith.mulf %75, %81 : vector<8x32xf32>
    %c2_i32 = arith.constant 2 : i32
    %c8_i32_29 = arith.constant 8 : i32
    %83 = arith.muli %c2_i32, %c8_i32_29 : i32
    %84 = tpu.assume_multiple %83, 8 : i32
    %85 = arith.index_cast %84 : i32 to index
    %c0_30 = arith.constant 0 : index
    %86 = vector.load %arg4[%85, %c0_30] : memref<96x128xf32, #tpu.memory_space<vmem>>, vector<8x128xf32>
    %cst_31 = arith.constant dense<0.000000e+00> : vector<8x128xf32>
    %87 = tpu.matmul %82, %36, %cst_31 {dimension_numbers = #tpu.dot_dimension_numbers<[1], [0], [0], [1], [0, 0, 1, 1], [], []>} : vector<8x32xf32>, vector<32x128xf32>, vector<8x128xf32> -> vector<8x128xf32>
    %88 = arith.addf %86, %87 : vector<8x128xf32>
    %89 = vector.extract_strided_slice %88 {offsets = [0, 0], sizes = [8, 96], strides = [1, 1]} : vector<8x128xf32> to vector<8x96xf32>
    %90 = arith.negf %89 : vector<8x96xf32>
    %91 = math.exp %90 : vector<8x96xf32>
    %cst_32 = arith.constant 1.000000e+00 : f32
    %92 = vector.broadcast %cst_32 : f32 to vector<8x96xf32>
    %93 = arith.addf %92, %91 : vector<8x96xf32>
    %94 = arith.divf %92, %93 : vector<8x96xf32>
    %95 = vector.extract_strided_slice %94 {offsets = [0, 0], sizes = [8, 32], strides = [1, 1]} : vector<8x96xf32> to vector<8x32xf32>
    %96 = vector.extract_strided_slice %94 {offsets = [0, 32], sizes = [8, 32], strides = [1, 1]} : vector<8x96xf32> to vector<8x32xf32>
    %97 = vector.extract_strided_slice %94 {offsets = [0, 64], sizes = [8, 32], strides = [1, 1]} : vector<8x96xf32> to vector<8x32xf32>
    %98 = vector.extract_strided_slice %88 {offsets = [0, 96], sizes = [8, 32], strides = [1, 1]} : vector<8x128xf32> to vector<8x32xf32>
    %99 = math.tanh %98 : vector<8x32xf32>
    %100 = arith.mulf %96, %80 : vector<8x32xf32>
    %101 = arith.mulf %95, %99 : vector<8x32xf32>
    %102 = arith.addf %100, %101 : vector<8x32xf32>
    %103 = math.tanh %102 : vector<8x32xf32>
    %104 = arith.mulf %97, %103 : vector<8x32xf32>
    %c3_i32 = arith.constant 3 : i32
    %c8_i32_33 = arith.constant 8 : i32
    %105 = arith.muli %c3_i32, %c8_i32_33 : i32
    %106 = tpu.assume_multiple %105, 8 : i32
    %107 = arith.index_cast %106 : i32 to index
    %c0_34 = arith.constant 0 : index
    %108 = vector.load %arg4[%107, %c0_34] : memref<96x128xf32, #tpu.memory_space<vmem>>, vector<8x128xf32>
    %cst_35 = arith.constant dense<0.000000e+00> : vector<8x128xf32>
    %109 = tpu.matmul %104, %36, %cst_35 {dimension_numbers = #tpu.dot_dimension_numbers<[1], [0], [0], [1], [0, 0, 1, 1], [], []>} : vector<8x32xf32>, vector<32x128xf32>, vector<8x128xf32> -> vector<8x128xf32>
    %110 = arith.addf %108, %109 : vector<8x128xf32>
    %111 = vector.extract_strided_slice %110 {offsets = [0, 0], sizes = [8, 96], strides = [1, 1]} : vector<8x128xf32> to vector<8x96xf32>
    %112 = arith.negf %111 : vector<8x96xf32>
    %113 = math.exp %112 : vector<8x96xf32>
    %cst_36 = arith.constant 1.000000e+00 : f32
    %114 = vector.broadcast %cst_36 : f32 to vector<8x96xf32>
    %115 = arith.addf %114, %113 : vector<8x96xf32>
    %116 = arith.divf %114, %115 : vector<8x96xf32>
    %117 = vector.extract_strided_slice %116 {offsets = [0, 0], sizes = [8, 32], strides = [1, 1]} : vector<8x96xf32> to vector<8x32xf32>
    %118 = vector.extract_strided_slice %116 {offsets = [0, 32], sizes = [8, 32], strides = [1, 1]} : vector<8x96xf32> to vector<8x32xf32>
    %119 = vector.extract_strided_slice %116 {offsets = [0, 64], sizes = [8, 32], strides = [1, 1]} : vector<8x96xf32> to vector<8x32xf32>
    %120 = vector.extract_strided_slice %110 {offsets = [0, 96], sizes = [8, 32], strides = [1, 1]} : vector<8x128xf32> to vector<8x32xf32>
    %121 = math.tanh %120 : vector<8x32xf32>
    %122 = arith.mulf %118, %102 : vector<8x32xf32>
    %123 = arith.mulf %117, %121 : vector<8x32xf32>
    %124 = arith.addf %122, %123 : vector<8x32xf32>
    %125 = math.tanh %124 : vector<8x32xf32>
    %126 = arith.mulf %119, %125 : vector<8x32xf32>
    %c4_i32 = arith.constant 4 : i32
    %c8_i32_37 = arith.constant 8 : i32
    %127 = arith.muli %c4_i32, %c8_i32_37 : i32
    %128 = tpu.assume_multiple %127, 8 : i32
    %129 = arith.index_cast %128 : i32 to index
    %c0_38 = arith.constant 0 : index
    %130 = vector.load %arg4[%129, %c0_38] : memref<96x128xf32, #tpu.memory_space<vmem>>, vector<8x128xf32>
    %cst_39 = arith.constant dense<0.000000e+00> : vector<8x128xf32>
    %131 = tpu.matmul %126, %36, %cst_39 {dimension_numbers = #tpu.dot_dimension_numbers<[1], [0], [0], [1], [0, 0, 1, 1], [], []>} : vector<8x32xf32>, vector<32x128xf32>, vector<8x128xf32> -> vector<8x128xf32>
    %132 = arith.addf %130, %131 : vector<8x128xf32>
    %133 = vector.extract_strided_slice %132 {offsets = [0, 0], sizes = [8, 96], strides = [1, 1]} : vector<8x128xf32> to vector<8x96xf32>
    %134 = arith.negf %133 : vector<8x96xf32>
    %135 = math.exp %134 : vector<8x96xf32>
    %cst_40 = arith.constant 1.000000e+00 : f32
    %136 = vector.broadcast %cst_40 : f32 to vector<8x96xf32>
    %137 = arith.addf %136, %135 : vector<8x96xf32>
    %138 = arith.divf %136, %137 : vector<8x96xf32>
    %139 = vector.extract_strided_slice %138 {offsets = [0, 0], sizes = [8, 32], strides = [1, 1]} : vector<8x96xf32> to vector<8x32xf32>
    %140 = vector.extract_strided_slice %138 {offsets = [0, 32], sizes = [8, 32], strides = [1, 1]} : vector<8x96xf32> to vector<8x32xf32>
    %141 = vector.extract_strided_slice %138 {offsets = [0, 64], sizes = [8, 32], strides = [1, 1]} : vector<8x96xf32> to vector<8x32xf32>
    %142 = vector.extract_strided_slice %132 {offsets = [0, 96], sizes = [8, 32], strides = [1, 1]} : vector<8x128xf32> to vector<8x32xf32>
    %143 = math.tanh %142 : vector<8x32xf32>
    %144 = arith.mulf %140, %124 : vector<8x32xf32>
    %145 = arith.mulf %139, %143 : vector<8x32xf32>
    %146 = arith.addf %144, %145 : vector<8x32xf32>
    %147 = math.tanh %146 : vector<8x32xf32>
    %148 = arith.mulf %141, %147 : vector<8x32xf32>
    %c5_i32 = arith.constant 5 : i32
    %c8_i32_41 = arith.constant 8 : i32
    %149 = arith.muli %c5_i32, %c8_i32_41 : i32
    %150 = tpu.assume_multiple %149, 8 : i32
    %151 = arith.index_cast %150 : i32 to index
    %c0_42 = arith.constant 0 : index
    %152 = vector.load %arg4[%151, %c0_42] : memref<96x128xf32, #tpu.memory_space<vmem>>, vector<8x128xf32>
    %cst_43 = arith.constant dense<0.000000e+00> : vector<8x128xf32>
    %153 = tpu.matmul %148, %36, %cst_43 {dimension_numbers = #tpu.dot_dimension_numbers<[1], [0], [0], [1], [0, 0, 1, 1], [], []>} : vector<8x32xf32>, vector<32x128xf32>, vector<8x128xf32> -> vector<8x128xf32>
    %154 = arith.addf %152, %153 : vector<8x128xf32>
    %155 = vector.extract_strided_slice %154 {offsets = [0, 0], sizes = [8, 96], strides = [1, 1]} : vector<8x128xf32> to vector<8x96xf32>
    %156 = arith.negf %155 : vector<8x96xf32>
    %157 = math.exp %156 : vector<8x96xf32>
    %cst_44 = arith.constant 1.000000e+00 : f32
    %158 = vector.broadcast %cst_44 : f32 to vector<8x96xf32>
    %159 = arith.addf %158, %157 : vector<8x96xf32>
    %160 = arith.divf %158, %159 : vector<8x96xf32>
    %161 = vector.extract_strided_slice %160 {offsets = [0, 0], sizes = [8, 32], strides = [1, 1]} : vector<8x96xf32> to vector<8x32xf32>
    %162 = vector.extract_strided_slice %160 {offsets = [0, 32], sizes = [8, 32], strides = [1, 1]} : vector<8x96xf32> to vector<8x32xf32>
    %163 = vector.extract_strided_slice %160 {offsets = [0, 64], sizes = [8, 32], strides = [1, 1]} : vector<8x96xf32> to vector<8x32xf32>
    %164 = vector.extract_strided_slice %154 {offsets = [0, 96], sizes = [8, 32], strides = [1, 1]} : vector<8x128xf32> to vector<8x32xf32>
    %165 = math.tanh %164 : vector<8x32xf32>
    %166 = arith.mulf %162, %146 : vector<8x32xf32>
    %167 = arith.mulf %161, %165 : vector<8x32xf32>
    %168 = arith.addf %166, %167 : vector<8x32xf32>
    %169 = math.tanh %168 : vector<8x32xf32>
    %170 = arith.mulf %163, %169 : vector<8x32xf32>
    %c6_i32 = arith.constant 6 : i32
    %c8_i32_45 = arith.constant 8 : i32
    %171 = arith.muli %c6_i32, %c8_i32_45 : i32
    %172 = tpu.assume_multiple %171, 8 : i32
    %173 = arith.index_cast %172 : i32 to index
    %c0_46 = arith.constant 0 : index
    %174 = vector.load %arg4[%173, %c0_46] : memref<96x128xf32, #tpu.memory_space<vmem>>, vector<8x128xf32>
    %cst_47 = arith.constant dense<0.000000e+00> : vector<8x128xf32>
    %175 = tpu.matmul %170, %36, %cst_47 {dimension_numbers = #tpu.dot_dimension_numbers<[1], [0], [0], [1], [0, 0, 1, 1], [], []>} : vector<8x32xf32>, vector<32x128xf32>, vector<8x128xf32> -> vector<8x128xf32>
    %176 = arith.addf %174, %175 : vector<8x128xf32>
    %177 = vector.extract_strided_slice %176 {offsets = [0, 0], sizes = [8, 96], strides = [1, 1]} : vector<8x128xf32> to vector<8x96xf32>
    %178 = arith.negf %177 : vector<8x96xf32>
    %179 = math.exp %178 : vector<8x96xf32>
    %cst_48 = arith.constant 1.000000e+00 : f32
    %180 = vector.broadcast %cst_48 : f32 to vector<8x96xf32>
    %181 = arith.addf %180, %179 : vector<8x96xf32>
    %182 = arith.divf %180, %181 : vector<8x96xf32>
    %183 = vector.extract_strided_slice %182 {offsets = [0, 0], sizes = [8, 32], strides = [1, 1]} : vector<8x96xf32> to vector<8x32xf32>
    %184 = vector.extract_strided_slice %182 {offsets = [0, 32], sizes = [8, 32], strides = [1, 1]} : vector<8x96xf32> to vector<8x32xf32>
    %185 = vector.extract_strided_slice %182 {offsets = [0, 64], sizes = [8, 32], strides = [1, 1]} : vector<8x96xf32> to vector<8x32xf32>
    %186 = vector.extract_strided_slice %176 {offsets = [0, 96], sizes = [8, 32], strides = [1, 1]} : vector<8x128xf32> to vector<8x32xf32>
    %187 = math.tanh %186 : vector<8x32xf32>
    %188 = arith.mulf %184, %168 : vector<8x32xf32>
    %189 = arith.mulf %183, %187 : vector<8x32xf32>
    %190 = arith.addf %188, %189 : vector<8x32xf32>
    %191 = math.tanh %190 : vector<8x32xf32>
    %192 = arith.mulf %185, %191 : vector<8x32xf32>
    %c7_i32 = arith.constant 7 : i32
    %c8_i32_49 = arith.constant 8 : i32
    %193 = arith.muli %c7_i32, %c8_i32_49 : i32
    %194 = tpu.assume_multiple %193, 8 : i32
    %195 = arith.index_cast %194 : i32 to index
    %c0_50 = arith.constant 0 : index
    %196 = vector.load %arg4[%195, %c0_50] : memref<96x128xf32, #tpu.memory_space<vmem>>, vector<8x128xf32>
    %cst_51 = arith.constant dense<0.000000e+00> : vector<8x128xf32>
    %197 = tpu.matmul %192, %36, %cst_51 {dimension_numbers = #tpu.dot_dimension_numbers<[1], [0], [0], [1], [0, 0, 1, 1], [], []>} : vector<8x32xf32>, vector<32x128xf32>, vector<8x128xf32> -> vector<8x128xf32>
    %198 = arith.addf %196, %197 : vector<8x128xf32>
    %199 = vector.extract_strided_slice %198 {offsets = [0, 0], sizes = [8, 96], strides = [1, 1]} : vector<8x128xf32> to vector<8x96xf32>
    %200 = arith.negf %199 : vector<8x96xf32>
    %201 = math.exp %200 : vector<8x96xf32>
    %cst_52 = arith.constant 1.000000e+00 : f32
    %202 = vector.broadcast %cst_52 : f32 to vector<8x96xf32>
    %203 = arith.addf %202, %201 : vector<8x96xf32>
    %204 = arith.divf %202, %203 : vector<8x96xf32>
    %205 = vector.extract_strided_slice %204 {offsets = [0, 0], sizes = [8, 32], strides = [1, 1]} : vector<8x96xf32> to vector<8x32xf32>
    %206 = vector.extract_strided_slice %204 {offsets = [0, 32], sizes = [8, 32], strides = [1, 1]} : vector<8x96xf32> to vector<8x32xf32>
    %207 = vector.extract_strided_slice %204 {offsets = [0, 64], sizes = [8, 32], strides = [1, 1]} : vector<8x96xf32> to vector<8x32xf32>
    %208 = vector.extract_strided_slice %198 {offsets = [0, 96], sizes = [8, 32], strides = [1, 1]} : vector<8x128xf32> to vector<8x32xf32>
    %209 = math.tanh %208 : vector<8x32xf32>
    %210 = arith.mulf %206, %190 : vector<8x32xf32>
    %211 = arith.mulf %205, %209 : vector<8x32xf32>
    %212 = arith.addf %210, %211 : vector<8x32xf32>
    %213 = math.tanh %212 : vector<8x32xf32>
    %214 = arith.mulf %207, %213 : vector<8x32xf32>
    %c8_i32_53 = arith.constant 8 : i32
    %c8_i32_54 = arith.constant 8 : i32
    %215 = arith.muli %c8_i32_53, %c8_i32_54 : i32
    %216 = tpu.assume_multiple %215, 8 : i32
    %217 = arith.index_cast %216 : i32 to index
    %c0_55 = arith.constant 0 : index
    %218 = vector.load %arg4[%217, %c0_55] : memref<96x128xf32, #tpu.memory_space<vmem>>, vector<8x128xf32>
    %cst_56 = arith.constant dense<0.000000e+00> : vector<8x128xf32>
    %219 = tpu.matmul %214, %36, %cst_56 {dimension_numbers = #tpu.dot_dimension_numbers<[1], [0], [0], [1], [0, 0, 1, 1], [], []>} : vector<8x32xf32>, vector<32x128xf32>, vector<8x128xf32> -> vector<8x128xf32>
    %220 = arith.addf %218, %219 : vector<8x128xf32>
    %221 = vector.extract_strided_slice %220 {offsets = [0, 0], sizes = [8, 96], strides = [1, 1]} : vector<8x128xf32> to vector<8x96xf32>
    %222 = arith.negf %221 : vector<8x96xf32>
    %223 = math.exp %222 : vector<8x96xf32>
    %cst_57 = arith.constant 1.000000e+00 : f32
    %224 = vector.broadcast %cst_57 : f32 to vector<8x96xf32>
    %225 = arith.addf %224, %223 : vector<8x96xf32>
    %226 = arith.divf %224, %225 : vector<8x96xf32>
    %227 = vector.extract_strided_slice %226 {offsets = [0, 0], sizes = [8, 32], strides = [1, 1]} : vector<8x96xf32> to vector<8x32xf32>
    %228 = vector.extract_strided_slice %226 {offsets = [0, 32], sizes = [8, 32], strides = [1, 1]} : vector<8x96xf32> to vector<8x32xf32>
    %229 = vector.extract_strided_slice %226 {offsets = [0, 64], sizes = [8, 32], strides = [1, 1]} : vector<8x96xf32> to vector<8x32xf32>
    %230 = vector.extract_strided_slice %220 {offsets = [0, 96], sizes = [8, 32], strides = [1, 1]} : vector<8x128xf32> to vector<8x32xf32>
    %231 = math.tanh %230 : vector<8x32xf32>
    %232 = arith.mulf %228, %212 : vector<8x32xf32>
    %233 = arith.mulf %227, %231 : vector<8x32xf32>
    %234 = arith.addf %232, %233 : vector<8x32xf32>
    %235 = math.tanh %234 : vector<8x32xf32>
    %236 = arith.mulf %229, %235 : vector<8x32xf32>
    %c9_i32 = arith.constant 9 : i32
    %c8_i32_58 = arith.constant 8 : i32
    %237 = arith.muli %c9_i32, %c8_i32_58 : i32
    %238 = tpu.assume_multiple %237, 8 : i32
    %239 = arith.index_cast %238 : i32 to index
    %c0_59 = arith.constant 0 : index
    %240 = vector.load %arg4[%239, %c0_59] : memref<96x128xf32, #tpu.memory_space<vmem>>, vector<8x128xf32>
    %cst_60 = arith.constant dense<0.000000e+00> : vector<8x128xf32>
    %241 = tpu.matmul %236, %36, %cst_60 {dimension_numbers = #tpu.dot_dimension_numbers<[1], [0], [0], [1], [0, 0, 1, 1], [], []>} : vector<8x32xf32>, vector<32x128xf32>, vector<8x128xf32> -> vector<8x128xf32>
    %242 = arith.addf %240, %241 : vector<8x128xf32>
    %243 = vector.extract_strided_slice %242 {offsets = [0, 0], sizes = [8, 96], strides = [1, 1]} : vector<8x128xf32> to vector<8x96xf32>
    %244 = arith.negf %243 : vector<8x96xf32>
    %245 = math.exp %244 : vector<8x96xf32>
    %cst_61 = arith.constant 1.000000e+00 : f32
    %246 = vector.broadcast %cst_61 : f32 to vector<8x96xf32>
    %247 = arith.addf %246, %245 : vector<8x96xf32>
    %248 = arith.divf %246, %247 : vector<8x96xf32>
    %249 = vector.extract_strided_slice %248 {offsets = [0, 0], sizes = [8, 32], strides = [1, 1]} : vector<8x96xf32> to vector<8x32xf32>
    %250 = vector.extract_strided_slice %248 {offsets = [0, 32], sizes = [8, 32], strides = [1, 1]} : vector<8x96xf32> to vector<8x32xf32>
    %251 = vector.extract_strided_slice %248 {offsets = [0, 64], sizes = [8, 32], strides = [1, 1]} : vector<8x96xf32> to vector<8x32xf32>
    %252 = vector.extract_strided_slice %242 {offsets = [0, 96], sizes = [8, 32], strides = [1, 1]} : vector<8x128xf32> to vector<8x32xf32>
    %253 = math.tanh %252 : vector<8x32xf32>
    %254 = arith.mulf %250, %234 : vector<8x32xf32>
    %255 = arith.mulf %249, %253 : vector<8x32xf32>
    %256 = arith.addf %254, %255 : vector<8x32xf32>
    %257 = math.tanh %256 : vector<8x32xf32>
    %258 = arith.mulf %251, %257 : vector<8x32xf32>
    %c10_i32 = arith.constant 10 : i32
    %c8_i32_62 = arith.constant 8 : i32
    %259 = arith.muli %c10_i32, %c8_i32_62 : i32
    %260 = tpu.assume_multiple %259, 8 : i32
    %261 = arith.index_cast %260 : i32 to index
    %c0_63 = arith.constant 0 : index
    %262 = vector.load %arg4[%261, %c0_63] : memref<96x128xf32, #tpu.memory_space<vmem>>, vector<8x128xf32>
    %cst_64 = arith.constant dense<0.000000e+00> : vector<8x128xf32>
    %263 = tpu.matmul %258, %36, %cst_64 {dimension_numbers = #tpu.dot_dimension_numbers<[1], [0], [0], [1], [0, 0, 1, 1], [], []>} : vector<8x32xf32>, vector<32x128xf32>, vector<8x128xf32> -> vector<8x128xf32>
    %264 = arith.addf %262, %263 : vector<8x128xf32>
    %265 = vector.extract_strided_slice %264 {offsets = [0, 0], sizes = [8, 96], strides = [1, 1]} : vector<8x128xf32> to vector<8x96xf32>
    %266 = arith.negf %265 : vector<8x96xf32>
    %267 = math.exp %266 : vector<8x96xf32>
    %cst_65 = arith.constant 1.000000e+00 : f32
    %268 = vector.broadcast %cst_65 : f32 to vector<8x96xf32>
    %269 = arith.addf %268, %267 : vector<8x96xf32>
    %270 = arith.divf %268, %269 : vector<8x96xf32>
    %271 = vector.extract_strided_slice %270 {offsets = [0, 0], sizes = [8, 32], strides = [1, 1]} : vector<8x96xf32> to vector<8x32xf32>
    %272 = vector.extract_strided_slice %270 {offsets = [0, 32], sizes = [8, 32], strides = [1, 1]} : vector<8x96xf32> to vector<8x32xf32>
    %273 = vector.extract_strided_slice %270 {offsets = [0, 64], sizes = [8, 32], strides = [1, 1]} : vector<8x96xf32> to vector<8x32xf32>
    %274 = vector.extract_strided_slice %264 {offsets = [0, 96], sizes = [8, 32], strides = [1, 1]} : vector<8x128xf32> to vector<8x32xf32>
    %275 = math.tanh %274 : vector<8x32xf32>
    %276 = arith.mulf %272, %256 : vector<8x32xf32>
    %277 = arith.mulf %271, %275 : vector<8x32xf32>
    %278 = arith.addf %276, %277 : vector<8x32xf32>
    %279 = math.tanh %278 : vector<8x32xf32>
    %280 = arith.mulf %273, %279 : vector<8x32xf32>
    %c11_i32 = arith.constant 11 : i32
    %c8_i32_66 = arith.constant 8 : i32
    %281 = arith.muli %c11_i32, %c8_i32_66 : i32
    %282 = tpu.assume_multiple %281, 8 : i32
    %283 = arith.index_cast %282 : i32 to index
    %c0_67 = arith.constant 0 : index
    %284 = vector.load %arg4[%283, %c0_67] : memref<96x128xf32, #tpu.memory_space<vmem>>, vector<8x128xf32>
    %cst_68 = arith.constant dense<0.000000e+00> : vector<8x128xf32>
    %285 = tpu.matmul %280, %36, %cst_68 {dimension_numbers = #tpu.dot_dimension_numbers<[1], [0], [0], [1], [0, 0, 1, 1], [], []>} : vector<8x32xf32>, vector<32x128xf32>, vector<8x128xf32> -> vector<8x128xf32>
    %286 = arith.addf %284, %285 : vector<8x128xf32>
    %287 = vector.extract_strided_slice %286 {offsets = [0, 0], sizes = [8, 96], strides = [1, 1]} : vector<8x128xf32> to vector<8x96xf32>
    %288 = arith.negf %287 : vector<8x96xf32>
    %289 = math.exp %288 : vector<8x96xf32>
    %cst_69 = arith.constant 1.000000e+00 : f32
    %290 = vector.broadcast %cst_69 : f32 to vector<8x96xf32>
    %291 = arith.addf %290, %289 : vector<8x96xf32>
    %292 = arith.divf %290, %291 : vector<8x96xf32>
    %293 = vector.extract_strided_slice %292 {offsets = [0, 0], sizes = [8, 32], strides = [1, 1]} : vector<8x96xf32> to vector<8x32xf32>
    %294 = vector.extract_strided_slice %292 {offsets = [0, 32], sizes = [8, 32], strides = [1, 1]} : vector<8x96xf32> to vector<8x32xf32>
    %295 = vector.extract_strided_slice %292 {offsets = [0, 64], sizes = [8, 32], strides = [1, 1]} : vector<8x96xf32> to vector<8x32xf32>
    %296 = vector.extract_strided_slice %286 {offsets = [0, 96], sizes = [8, 32], strides = [1, 1]} : vector<8x128xf32> to vector<8x32xf32>
    %297 = math.tanh %296 : vector<8x32xf32>
    %298 = arith.mulf %294, %278 : vector<8x32xf32>
    %299 = arith.mulf %293, %297 : vector<8x32xf32>
    %300 = arith.addf %298, %299 : vector<8x32xf32>
    %301 = math.tanh %300 : vector<8x32xf32>
    %302 = arith.mulf %295, %301 : vector<8x32xf32>
    %c12_i32 = arith.constant 12 : i32
    %c104 = arith.constant 104 : index
    %c0_70 = arith.constant 0 : index
    %303 = vector.load %arg2[%c104, %c0_70] : memref<120x128xf32, #tpu.memory_space<vmem>>, vector<1x32xf32>
    %c112 = arith.constant 112 : index
    %c0_71 = arith.constant 0 : index
    %304 = vector.load %arg2[%c112, %c0_71] : memref<120x128xf32, #tpu.memory_space<vmem>>, vector<1x1xf32>
    %cst_72 = arith.constant 0.000000e+00 : f32
    %305 = vector.broadcast %cst_72 : f32 to vector<8x32xf32>
    %306 = arith.maximumf %302, %305 : vector<8x32xf32>
    %307 = vector.broadcast %303 : vector<1x32xf32> to vector<8x32xf32>
    %308 = arith.mulf %306, %307 : vector<8x32xf32>
    %cst_73 = arith.constant dense<0.000000e+00> : vector<8xf32>
    %309 = vector.multi_reduction <add>, %308, %cst_73 [1] : vector<8x32xf32> to vector<8xf32>
    %310 = vector.shape_cast %309 : vector<8xf32> to vector<8x1xf32>
    %311 = vector.broadcast %304 : vector<1x1xf32> to vector<8x1xf32>
    %312 = arith.addf %310, %311 : vector<8x1xf32>
    %c0_74 = arith.constant 0 : index
    %c0_75 = arith.constant 0 : index
    %313 = vector.load %arg3[%c0_74, %c0_75] : memref<8x1xf32, #tpu.memory_space<vmem>>, vector<8x1xf32>
    tpu.vector_store %arg3[%c0_74, %c0_75], %312 {strides = array<i32>} : memref<8x1xf32, #tpu.memory_space<vmem>>, vector<8x1xf32>,
    return
  }
  func.func @transform_0(%arg0: i32) -> (i32, i32, i32) {
    %c0_i32 = arith.constant 0 : i32
    %c0_i32_0 = arith.constant 0 : i32
    %c0_i32_1 = arith.constant 0 : i32
    return %c0_i32, %arg0, %c0_i32_0 : i32, i32, i32
  }
  func.func @transform_1(%arg0: i32) -> (i32, i32) {
    %c0_i32 = arith.constant 0 : i32
    %c0_i32_0 = arith.constant 0 : i32
    %c0_i32_1 = arith.constant 0 : i32
    return %c0_i32, %c0_i32_0 : i32, i32
  }
  func.func @transform_2(%arg0: i32) -> (i32, i32) {
    %c0_i32 = arith.constant 0 : i32
    %c0_i32_0 = arith.constant 0 : i32
    return %arg0, %c0_i32 : i32, i32
  }
}

</mosaic_0001>

<bundles_post_ra>
// kernel: tpu_custom_call.1
= control target key start
LH: loop header
LB: loop body
LE: loop exit
PB: predicated region body
PF: predicated region fallthrough
CT: control target
= control target key end

     0   :  { %vm66_vm0 = vcmask 1043456   ;;  %vm29_vm1 = vcmask 31744   ;;  %v1553_v47 = vmov 0.0   ;;  %vm440_vm2 = vcmask 130048   ;;  %s1554_s10 = smov 32   ;;  %s1555_s11 = smov 64   ;;  %s1939_s1 = inlined_call_operand.vmem [shape: f32[120,128], index: 1, kind: input, shape index: {}]   ;;  %s1940_s0 = inlined_call_operand.vmem [shape: f32[16,8,4], index: 0, kind: input, shape index: {}]   ;;  %s1941_s2 = inlined_call_operand.vmem [shape: f32[8,1], index: 2, kind: output, shape index: {}]  }
   0x1   :  { %v28_v0 = vld [vmem:[%s1939_s1] sm:$0xf]  ;;  %v1580_v2 = vld [vmem:[%s1940_s0 + $0x48] sm:$0xff]  ;;  %v1599_v6 = vld [vmem:[%s1940_s0 + $0x50] sm:$0xff]  ;;  %vm547_vm7 = vcmask 261120  }
   0x2   :  { %v11_v1 = vld [vmem:[%s1940_s0] sm:$0xff]  ;;  %1348 = vmatpush.msk.msra.mxu0 %vm66_vm0, %v28_v0  ;;  %1448 = vmatpush.msk.msra.mxu2 %vm66_vm0, %v28_v0  ;;  %v136_v4 = vld [vmem:[%s1939_s1 + $0x8] sm:$0xf]  ;;  %v208_v7 = vld [vmem:[%s1939_s1 + $0x10] sm:$0xf] }
   0x3   :  { %v352_v3 = vld [vmem:[%s1939_s1 + $0x20] sm:$0xf]  ;;  %v12_v5 = vld [vmem:[%s1940_s0 + $0x8] sm:$0xff]  ;;  %1349 = vmatmul.msk.f32.vlgmr.msra.gmra.mxu0 %vm29_vm1, %v11_v1  ;;  %1358 = vmatmul.msk.f32.vlgmr.msra.gmra.mxu2 %vm29_vm1, %v1580_v2  ;;  %v280_v8 = vld [vmem:[%s1939_s1 + $0x18] sm:$0xf] }
   0x4   :  { %1400 = vmatpush.msk.msrb.mxu0 %vm66_vm0, %v352_v3  ;;  %1361 = vmatpush.msk.msra.mxu1 %vm66_vm0, %v136_v4  ;;  %v13_v9 = vld [vmem:[%s1940_s0 + $0x10] sm:$0xff]  ;;  %v1624_v10 = vld [vmem:[%s1940_s0 + $0x58] sm:$0xff]  ;;  %v1638_v12 = vld [vmem:[%s1940_s0 + $0x60] sm:$0xff] }
   0x5   :  { %1449 = vmatpush.msk.msra.mxu3 %vm66_vm0, %v136_v4  ;;  %1362 = vmatmul.msk.f32.vlgmr.msra.gmra.mxu1 %vm29_vm1, %v12_v5  ;;  %v14_v11 = vld [vmem:[%s1940_s0 + $0x18] sm:$0xff]  ;;  %v15_v13 = vld [vmem:[%s1940_s0 + $0x20] sm:$0xff]  ;;  %v16_v14 = vld [vmem:[%s1940_s0 + $0x28] sm:$0xff] }
   0x6   :  { %1371 = vmatmul.msk.f32.vlgmr.msra.gmra.mxu3 %vm29_vm1, %v1599_v6  ;;  %1374 = vmatpush.msk.msrb.mxu2 %vm66_vm0, %v208_v7  ;;  %v17_v15 = vld [vmem:[%s1940_s0 + $0x30] sm:$0xff]  ;;  %v18_v16 = vld [vmem:[%s1940_s0 + $0x38] sm:$0xff]  ;;  %v19_v17 = vld [vmem:[%s1940_s0 + $0x40] sm:$0xff] }
   0x7   :  { %1387 = vmatpush.msk.msrb.mxu3 %vm66_vm0, %v280_v8  ;;  %v1686_v18 = vld [vmem:[%s1939_s1 + $0x58] sm:$0xff]  ;;  %v1707_v19 = vld [vmem:[%s1939_s1 + $0x50] sm:$0xff]  ;;  %v24_v21 = vld [vmem:[%s1940_s0 + $0x68] sm:$0xff] }
   0x8   :  { %563 = vmatpush.msra.mxu2 %v1686_v18  ;;  %v437_v20 = vld [vmem:[%s1939_s1 + $0x38] sm:$0xff]  ;;  %v25_v22 = vld [vmem:[%s1940_s0 + $0x70] sm:$0xff]  ;;  %v1736_v23 = vld [vmem:[%s1939_s1 + $0x48] sm:$0xff] }
   0x9   :  { %628 = vmatpush.msra.mxu3 %v1686_v18  ;;  %491 = vmatpush.msrb.mxu1 %v437_v20  ;;  %v1747_v25 = vld [vmem:[%s1939_s1 + $0x28] ss:$0 sm:$0xff]  ;;  %v436_v31 = vld [vmem:[%s1939_s1 + $0x30] sm:$0xff]  ;;  %v1763_v37 = vld [vmem:[%s1939_s1 + $0x40] sm:$0xff] }
   0xa   :  { %564 = vmatpush.msra.mxu2 %v1707_v19  ;;  %v26_v44 = vld [vmem:[%s1940_s0 + $0x78] sm:$0xff] }
   0xb   :  { %1350 = vmatmul.msk.f32.gmra.mxu0 %vm29_vm1, %v12_v5  ;;  %1359 = vmatmul.msk.f32.gmra.mxu2 %vm29_vm1, %v1599_v6 }
   0xc   :  { %629 = vmatpush.msra.mxu3 %v1707_v19  ;;  %565 = vmatpush.msra.mxu2 %v1736_v23 }
   0xd   :  { %1363 = vmatmul.msk.f32.gmra.mxu1 %vm29_vm1, %v13_v9 }
   0xe   :  { %1372 = vmatmul.msk.f32.gmra.mxu3 %vm29_vm1, %v1624_v10  ;;  %492 = vmatpush.msrb.mxu1 %v436_v31 }
   0xf   :  { %630 = vmatpush.msra.mxu3 %v1736_v23  ;;  %566 = vmatpush.msra.mxu2 %v1763_v37 }
  0x11   :  { %631 = vmatpush.msra.mxu3 %v1763_v37 }
  0x13   :  { %1351 = vmatmul.msk.f32.gmra.mxu0 %vm29_vm1, %v13_v9  ;;  %1360 = vmatmul.msk.f32.gmra.mxu2 %vm29_vm1, %v1624_v10 }
  0x15   :  { %1364 = vmatmul.msk.f32.gmra.mxu1 %vm29_vm1, %v14_v11 }
  0x16   :  { %1373 = vmatmul.msk.f32.gmra.mxu3 %vm29_vm1, %v1638_v12 }
  0x1b   :  { %1352 = vmatmul.msk.f32.gmra.mxu0 %vm29_vm1, %v14_v11  ;;  %1375 = vmatmul.msk.f32.vlgmr.msrb.gmra.mxu2 %vm29_vm1, %v13_v9 }
  0x1c   :  { %693 = vmatpush.msrb.mxu2 %v1686_v18 }
  0x1d   :  { %1365 = vmatmul.msk.f32.gmra.mxu1 %vm29_vm1, %v15_v13 }
  0x1e   :  { %1388 = vmatmul.msk.f32.vlgmr.msrb.gmra.mxu3 %vm29_vm1, %v14_v11  ;;  %694 = vmatpush.msrb.mxu2 %v1707_v19 }
  0x1f   :  { %758 = vmatpush.msrb.mxu3 %v1686_v18 }
  0x20   :  { %695 = vmatpush.msrb.mxu2 %v1736_v23 }
  0x21   :  { %759 = vmatpush.msrb.mxu3 %v1707_v19 }
  0x22   :  { %696 = vmatpush.msrb.mxu2 %v1763_v37 }
  0x23   :  { %1353 = vmatmul.msk.f32.gmra.mxu0 %vm29_vm1, %v15_v13  ;;  %1376 = vmatmul.msk.f32.gmra.mxu2 %vm29_vm1, %v14_v11 }
  0x24   :  { %760 = vmatpush.msrb.mxu3 %v1736_v23 }
  0x25   :  { %1366 = vmatmul.msk.f32.gmra.mxu1 %vm29_vm1, %v16_v14 }
  0x26   :  { %1389 = vmatmul.msk.f32.gmra.mxu3 %vm29_vm1, %v15_v13 }
  0x27   :  { %761 = vmatpush.msrb.mxu3 %v1763_v37 }
  0x2b   :  { %1354 = vmatmul.msk.f32.gmra.mxu0 %vm29_vm1, %v16_v14  ;;  %1377 = vmatmul.msk.f32.gmra.mxu2 %vm29_vm1, %v15_v13 }
  0x2d   :  { %1367 = vmatmul.msk.f32.gmra.mxu1 %vm29_vm1, %v17_v15 }
  0x2e   :  { %1390 = vmatmul.msk.f32.gmra.mxu3 %vm29_vm1, %v16_v14 }
  0x33   :  { %1355 = vmatmul.msk.f32.gmra.mxu0 %vm29_vm1, %v17_v15  ;;  %1378 = vmatmul.msk.f32.gmra.mxu2 %vm29_vm1, %v16_v14 }
  0x35   :  { %1368 = vmatmul.msk.f32.gmra.mxu1 %vm29_vm1, %v18_v16 }
  0x36   :  { %1391 = vmatmul.msk.f32.gmra.mxu3 %vm29_vm1, %v17_v15 }
  0x3b   :  { %1356 = vmatmul.msk.f32.gmra.mxu0 %vm29_vm1, %v18_v16  ;;  %1379 = vmatmul.msk.f32.gmra.mxu2 %vm29_vm1, %v17_v15 }
  0x3d   :  { %1369 = vmatmul.msk.f32.gmra.mxu1 %vm29_vm1, %v19_v17 }
  0x3e   :  { %1392 = vmatmul.msk.f32.gmra.mxu3 %vm29_vm1, %v18_v16 }
  0x43   :  { %1357 = vmatmul.msk.f32.gmra.mxu0 %vm29_vm1, %v19_v17  ;;  %1380 = vmatmul.msk.f32.gmra.mxu2 %vm29_vm1, %v18_v16 }
  0x45   :  { %1370 = vmatmul.msk.f32.gmra.mxu1 %vm29_vm1, %v1580_v2 }
  0x46   :  { %1393 = vmatmul.msk.f32.gmra.mxu3 %vm29_vm1, %v19_v17 }
  0x4b   :  { %1381 = vmatmul.msk.f32.gmra.mxu2 %vm29_vm1, %v19_v17  ;;  %1401 = vmatmul.msk.f32.vlgmr.msrb.gmra.mxu0 %vm29_vm1, %v15_v13 }
  0x4e   :  { %1394 = vmatmul.msk.f32.gmra.mxu3 %vm29_vm1, %v1580_v2 }
  0x53   :  { %1382 = vmatmul.msk.f32.gmra.mxu2 %vm29_vm1, %v1580_v2  ;;  %1402 = vmatmul.msk.f32.gmra.mxu0 %vm29_vm1, %v16_v14 }
  0x56   :  { %1395 = vmatmul.msk.f32.gmra.mxu3 %vm29_vm1, %v1599_v6 }
  0x5b   :  { %1383 = vmatmul.msk.f32.gmra.mxu2 %vm29_vm1, %v1599_v6  ;;  %1403 = vmatmul.msk.f32.gmra.mxu0 %vm29_vm1, %v17_v15 }
  0x5e   :  { %1396 = vmatmul.msk.f32.gmra.mxu3 %vm29_vm1, %v1624_v10 }
  0x63   :  { %1384 = vmatmul.msk.f32.gmra.mxu2 %vm29_vm1, %v1624_v10  ;;  %1404 = vmatmul.msk.f32.gmra.mxu0 %vm29_vm1, %v18_v16 }
  0x66   :  { %1397 = vmatmul.msk.f32.gmra.mxu3 %vm29_vm1, %v1638_v12 }
  0x6b   :  { %1385 = vmatmul.msk.f32.gmra.mxu2 %vm29_vm1, %v1638_v12  ;;  %1405 = vmatmul.msk.f32.gmra.mxu0 %vm29_vm1, %v19_v17 }
  0x6e   :  { %1398 = vmatmul.msk.f32.gmra.mxu3 %vm29_vm1, %v24_v21 }
  0x73   :  { %1386 = vmatmul.msk.f32.gmra.mxu2 %vm29_vm1, %v24_v21  ;;  %1406 = vmatmul.msk.f32.gmra.mxu0 %vm29_vm1, %v1580_v2 }
  0x76   :  { %1399 = vmatmul.msk.f32.gmra.mxu3 %vm29_vm1, %v25_v22 }
  0x7b   :  { %1407 = vmatmul.msk.f32.gmra.mxu0 %vm29_vm1, %v1599_v6  ;;  %567 = vmatmul.f32.vlgmr.msra.gmra.mxu2 %v1553_v47 }
  0x7c   :  { %823 = vmatpush.msra.mxu2 %v1686_v18 }
  0x7e   :  { %824 = vmatpush.msra.mxu2 %v1707_v19 }
  0x80   :  { %v87_v24 = vpop.f32.mrf.mxu0  ;;  %825 = vmatpush.msra.mxu2 %v1736_v23 }
  0x81   :  { %v124_v55 = vadd.f32 %v1747_v25, %v87_v24 }
  0x82   :  { %v160_v48 = vpop.f32.mrf.mxu1  ;;  %826 = vmatpush.msra.mxu2 %v1763_v37 }
  0x83   :  { %1408 = vmatmul.msk.f32.gmra.mxu0 %vm29_vm1, %v1624_v10  ;;  %v196_v58 = vadd.f32 %v160_v48, %v124_v55 }
  0x86   :  { %v114_v26 = vpop.f32.mrf.mxu2 }
  0x87   :  { %v133_v27 = vadd.f32 %v1747_v25, %v114_v26 }
  0x88   :  { %v90_v28 = vpop.f32.mrf.mxu0 }
  0x89   :  { %v187_v29 = vpop.f32.mrf.mxu3  ;;  %v125_v63 = vadd.f32 %v1747_v25, %v90_v28 }
  0x8a   :  { %v1750_v30 = vadd.f32 %v187_v29, %v133_v27  ;;  %v163_v52 = vpop.f32.mrf.mxu1 }
  0x8b   :  { %1409 = vmatmul.msk.f32.gmra.mxu0 %vm29_vm1, %v1638_v12  ;;  %v197_v3 = vadd.f32 %v163_v52, %v125_v63 }
  0x8e   :  { %v117_v32 = vpop.f32.mrf.mxu2 }
  0x8f   :  { %v134_v33 = vadd.f32 %v1747_v25, %v117_v32 }
  0x90   :  { %v93_v34 = vpop.f32.mrf.mxu0 }
  0x91   :  { %v190_v35 = vpop.f32.mrf.mxu3  ;;  %v126_v9 = vadd.f32 %v1747_v25, %v93_v34 }
  0x92   :  { %v1758_v36 = vadd.f32 %v190_v35, %v134_v33  ;;  %v166_v59 = vpop.f32.mrf.mxu1 }
  0x93   :  { %1410 = vmatmul.msk.f32.gmra.mxu0 %vm29_vm1, %v24_v21  ;;  %v198_v12 = vadd.f32 %v166_v59, %v126_v9 }
  0x96   :  { %v120_v38 = vpop.f32.mrf.mxu2 }
  0x97   :  { %v135_v39 = vadd.f32 %v1747_v25, %v120_v38 }
  0x98   :  { %v96_v40 = vpop.f32.mrf.mxu0 }
  0x99   :  { %v193_v41 = vpop.f32.mrf.mxu3  ;;  %v127_v17 = vadd.f32 %v1747_v25, %v96_v40 }
  0x9a   :  { %v1775_v42 = vadd.f32 %v193_v41, %v135_v39  ;;  %v169_v5 = vpop.f32.mrf.mxu1 }
  0x9b   :  { %1411 = vmatmul.msk.f32.gmra.mxu0 %vm29_vm1, %v25_v22  ;;  %v199_v26 = vadd.f32 %v169_v5, %v127_v17 }
  0x9e   :  { %v232_v46 = vpop.f32.mrf.mxu2 }
  0x9f   :  { %v268_v62 = vadd.f32 %v232_v46, %v196_v58 }
  0xa0   :  { %v99_v43 = vpop.f32.mrf.mxu0 }
  0xa1   :  { %v304_v49 = vpop.f32.mrf.mxu3  ;;  %v128_v32 = vadd.f32 %v1747_v25, %v99_v43 }
  0xa2   :  { %v340_v0 = vadd.f32 %v304_v49, %v268_v62  ;;  %v172_v20 = vpop.f32.mrf.mxu1 }
  0xa3   :  { %1412 = vmatmul.msk.f32.gmra.mxu0 %vm29_vm1, %v26_v44  ;;  %v200_v39 = vadd.f32 %v172_v20, %v128_v32 }
  0xa6   :  { %v235_v51 = vpop.f32.mrf.mxu2 }
  0xa7   :  { %v269_v6 = vadd.f32 %v235_v51, %v197_v3 }
  0xa8   :  { %v1784_v45 = vpop.f32.mrf.mxu0 }
  0xa9   :  { %v307_v53 = vpop.f32.mrf.mxu3  ;;  %v129_v46 = vadd.f32 %v1747_v25, %v1784_v45 }
  0xaa   :  { %v341_v10 = vadd.f32 %v307_v53, %v269_v6  ;;  %v175_v33 = vpop.f32.mrf.mxu1 }
  0xab   :  { %v201_v51 = vadd.f32 %v175_v33, %v129_v46 }
  0xae   :  { %v238_v56 = vpop.f32.mrf.mxu2 }
  0xaf   :  { %v270_v15 = vadd.f32 %v238_v56, %v198_v12 }
  0xb0   :  { %v1789_v50 = vpop.f32.mrf.mxu0 }
  0xb1   :  { %v310_v61 = vpop.f32.mrf.mxu3 }
  0xb2   :  { %v342_v22 = vadd.f32 %v310_v61, %v270_v15  ;;  %v178_v52 = vpop.f32.mrf.mxu1 }
  0xb6   :  { %v241_v1 = vpop.f32.mrf.mxu2 }
  0xb7   :  { %v271_v28 = vadd.f32 %v241_v1, %v199_v26 }
  0xb8   :  { %v1792_v54 = vpop.f32.mrf.mxu0 }
  0xb9   :  { %v313_v8 = vpop.f32.mrf.mxu3  ;;  %v131_v3 = vadd.f32 %v1747_v25, %v1792_v54 }
  0xba   :  { %v343_v34 = vadd.f32 %v313_v8, %v271_v28  ;;  %v181_v1 = vpop.f32.mrf.mxu1 }
  0xbb   :  { %v203_v6 = vadd.f32 %v181_v1, %v131_v3 }
  0xbe   :  { %v244_v14 = vpop.f32.mrf.mxu2 }
  0xbf   :  { %v272_v41 = vadd.f32 %v244_v14, %v200_v39 }
  0xc0   :  { %v111_v57 = vpop.f32.mrf.mxu0 }
  0xc1   :  { %v1796_v60 = vadd.f32 %v1747_v25, %v111_v57  ;;  %v316_v21 = vpop.f32.mrf.mxu3  ;;  %v130_v57 = vadd.f32 %v1747_v25, %v1789_v50 }
  0xc2   :  { %v344_v48 = vadd.f32 %v316_v21, %v272_v41 }
  0xc3   :  { %v202_v45 = vadd.f32 %v178_v52, %v130_v57 }
  0xc6   :  { %v247_v31 = vpop.f32.mrf.mxu2 }
  0xc7   :  { %v273_v55 = vadd.f32 %v247_v31, %v201_v51 }
  0xc8   :  { %v376_v2 = vpop.f32.mrf.mxu0 }
  0xc9   :  { %v412_v4 = vadd.f32 %v376_v2, %v340_v0  ;;  %v319_v35 = vpop.f32.mrf.mxu3 }
  0xca   :  { %v345_v58 = vadd.f32 %v319_v35, %v273_v55 }
  0xcb   :  { %v424_v7 = vmax.f32 %v412_v4, 0.0 }
  0xcd   :  { %1413 = vmatmul.msk.f32.vlgmr.msrb.gmra.mxu1 %vm440_vm2, %v424_v7 }
  0xce   :  { %v250_v47 = vpop.f32.mrf.mxu2 }
  0xcf   :  { %v274_v63 = vadd.f32 %v250_v47, %v202_v45 }
  0xd0   :  { %v379_v11 = vpop.f32.mrf.mxu0 }
  0xd1   :  { %v413_v13 = vadd.f32 %v379_v11, %v341_v10  ;;  %v322_v53 = vpop.f32.mrf.mxu3  ;;  %v184_v10 = vpop.f32.mrf.mxu1 }
  0xd2   :  { %v346_v4 = vadd.f32 %v322_v53, %v274_v63  ;;  %v204_v14 = vadd.f32 %v184_v10, %v1796_v60 }
  0xd3   :  { %v425_v16 = vmax.f32 %v413_v13, 0.0 }
  0xd5   :  { %1414 = vmatmul.msk.f32.gmra.mxu1 %vm440_vm2, %v425_v16 }
  0xd6   :  { %v253_v59 = vpop.f32.mrf.mxu2 }
  0xd7   :  { %v275_v8 = vadd.f32 %v253_v59, %v203_v6 }
  0xd8   :  { %v382_v24 = vpop.f32.mrf.mxu0 }
  0xd9   :  { %v414_v27 = vadd.f32 %v382_v24, %v342_v22  ;;  %v325_v2 = vpop.f32.mrf.mxu3 }
  0xda   :  { %v347_v12 = vadd.f32 %v325_v2, %v275_v8 }
  0xdb   :  { %v426_v29 = vmax.f32 %v414_v27, 0.0 }
  0xdd   :  { %1415 = vmatmul.msk.f32.gmra.mxu1 %vm440_vm2, %v426_v29 }
  0xde   :  { %v256_v7 = vpop.f32.mrf.mxu2 }
  0xdf   :  { %v276_v16 = vadd.f32 %v256_v7, %v204_v14 }
  0xe0   :  { %v385_v38 = vpop.f32.mrf.mxu0 }
  0xe1   :  { %v415_v40 = vadd.f32 %v385_v38, %v343_v34  ;;  %v328_v11 = vpop.f32.mrf.mxu3 }
  0xe2   :  { %v348_v17 = vadd.f32 %v328_v11, %v276_v16 }
  0xe3   :  { %v427_v44 = vmax.f32 %v415_v40, 0.0 }
  0xe5   :  { %1416 = vmatmul.msk.f32.gmra.mxu1 %vm440_vm2, %v427_v44 }
  0xe6   :  { %v259_v54 = vpop.f32.mrf.mxu2 }
  0xe7   :  { %v277_v24 = vadd.f32 %v259_v54, %v1750_v30 }
  0xe8   :  { %v388_v49 = vpop.f32.mrf.mxu0 }
  0xe9   :  { %v416_v43 = vadd.f32 %v388_v49, %v344_v48  ;;  %v331_v20 = vpop.f32.mrf.mxu3 }
  0xea   :  { %v349_v28 = vadd.f32 %v331_v20, %v277_v24 }
  0xeb   :  { %v428_v56 = vmax.f32 %v416_v43, 0.0 }
  0xed   :  { %1417 = vmatmul.msk.f32.gmra.mxu1 %vm440_vm2, %v428_v56 }
  0xee   :  { %v262_v27 = vpop.f32.mrf.mxu2 }
  0xef   :  { %v278_v32 = vadd.f32 %v262_v27, %v1758_v36  ;;  %v1827_v36 = vld [vmem:[%s1939_s1 + $0x60] ss:$0 sm:$0xff] }
  0xf0   :  { %v391_v61 = vpop.f32.mrf.mxu0 }
  0xf1   :  { %v417_v62 = vadd.f32 %v391_v61, %v345_v58  ;;  %v334_v60 = vpop.f32.mrf.mxu3 }
  0xf2   :  { %v350_v34 = vadd.f32 %v334_v60, %v278_v32 }
  0xf3   :  { %v429_v0 = vmax.f32 %v417_v62, 0.0 }
  0xf5   :  { %1418 = vmatmul.msk.f32.gmra.mxu1 %vm440_vm2, %v429_v0 }
  0xf6   :  { %v265_v35 = vpop.f32.mrf.mxu2 }
  0xf7   :  { %v279_v40 = vadd.f32 %v265_v35, %v1775_v42 }
  0xf8   :  { %v394_v5 = vpop.f32.mrf.mxu0 }
  0xf9   :  { %v418_v50 = vadd.f32 %v394_v5, %v346_v4  ;;  %v337_v41 = vpop.f32.mrf.mxu3 }
  0xfa   :  { %v351_v44 = vadd.f32 %v337_v41, %v279_v40 }
  0xfb   :  { %v430_v9 = vmax.f32 %v418_v50, 0.0 }
  0xfd   :  { %1419 = vmatmul.msk.f32.gmra.mxu1 %vm440_vm2, %v430_v9 }
  0xfe   :  { %v568_v51 = vpop.f32.mrf.mxu2 }
 0x100   :  { %v397_v13 = vpop.f32.mrf.mxu0 }
 0x101   :  { %v419_v15 = vadd.f32 %v397_v13, %v347_v12 }
 0x103   :  { %v431_v25 = vmax.f32 %v419_v15, 0.0 }
 0x105   :  { %1420 = vmatmul.msk.f32.gmra.mxu1 %vm440_vm2, %v431_v25 }
 0x108   :  { %v400_v21 = vpop.f32.mrf.mxu0 }
 0x109   :  { %v420_v22 = vadd.f32 %v400_v21, %v348_v17 }
 0x10b   :  { %v432_v26 = vmax.f32 %v420_v22, 0.0 }
 0x10d   :  { %1421 = vmatmul.msk.f32.gmra.mxu1 %vm440_vm2, %v432_v26 }
 0x110   :  { %v403_v29 = vpop.f32.mrf.mxu0 }
 0x111   :  { %v421_v31 = vadd.f32 %v403_v29, %v349_v28 }
 0x113   :  { %v433_v33 = vmax.f32 %v421_v31, 0.0 }
 0x115   :  { %1422 = vmatmul.msk.f32.gmra.mxu1 %vm440_vm2, %v433_v33 }
 0x118   :  { %v406_v38 = vpop.f32.mrf.mxu0 }
 0x119   :  { %v422_v39 = vadd.f32 %v406_v38, %v350_v34 }
 0x11b   :  { %v434_v30 = vmax.f32 %v422_v39, 0.0 }
 0x11d   :  { %1423 = vmatmul.msk.f32.gmra.mxu1 %vm440_vm2, %v434_v30 }
 0x120   :  { %v409_v46 = vpop.f32.mrf.mxu0 }
 0x121   :  { %v423_v47 = vadd.f32 %v409_v46, %v351_v44 }
 0x123   :  { %v435_v48 = vmax.f32 %v423_v47, 0.0 }
 0x125   :  { %1424 = vmatmul.msk.f32.gmra.mxu1 %vm440_vm2, %v435_v48 }
 0x14a   :  { %v494_v49 = vpop.f32.mrf.mxu1 }
 0x14b   :  { %v495_v43 = vadd.f32 %v1827_v36, %v494_v49 }
 0x14d   :  { %v571_v42 = vadd.f32 %v568_v51, %v495_v43 }
 0x14f   :  { %1457 = vtanh.f32 %v571_v42  ;;  %v1425_v53 = vmul.f32 -1.442695, %v571_v42 }
 0x151   :  { %1459 = vpow2.f32 %v1425_v53 }
 0x152   :  { %v497_v11 = vpop.f32.mrf.mxu1 }
 0x153   :  { %v498_v12 = vadd.f32 %v1827_v36, %v497_v11 }
 0x155   :  { %v1458_v52 = vpop.eup %1457 }
 0x156   :  { %594 = vrot.lane.b32.xlu0 %v1458_v52, %s1554_s10 }
 0x157   :  { %v1460_v55 = vpop.eup %1459 }
 0x158   :  { %v575_v56 = vadd.f32 1.0, %v1460_v55 }
 0x15a   :  { %1461 = vrcp.f32 %v575_v56  ;;  %v587_v62 = vand.u32 2147483648, %v575_v56  ;;  %vm581_vm4 = vweird.f32 %v575_v56  ;;  %v585_v63 = vand.u32 2147483647, %v575_v56  ;;  %v500_v41 = vpop.f32.mrf.mxu1 }
 0x15b   :  { %v501_v44 = vadd.f32 %v1827_v36, %v500_v41 }
 0x15c   :  { %v588_v1 = vor.u32 1.1754944e-38, %v587_v62  ;;  %vm586_vm6 = vcmp.eq.f32.partialorder %v585_v63, 8.507059e+37 }
 0x160   :  { %v1462_v57 = vpop.eup %1461 }
 0x161   :  { %v577_v58 = vmul.f32 %v1462_v57, %v575_v56  ;;  %vm582_vm3 = vweird.f32 %v1462_v57 }
 0x162   :  { %vm583_vm5 = vmor %vm581_vm4, %vm582_vm3 }
 0x163   :  { %v578_v59 = vsub.f32 1.0, %v577_v58 }
 0x165   :  { %v579_v61 = vmul.f32 %v1462_v57, %v578_v59 }
 0x167   :  { %v580_v45 = vadd.f32 %v1462_v57, %v579_v61 }
 0x169   :  { %v584_v0 = vsel %vm583_vm5, %v1462_v57, %v580_v45 }
 0x16a   :  { %v589_v3 = vsel %vm586_vm6, %v588_v1, %v584_v0 }
 0x16b   :  { %v592_v5 = vmul.f32 0.0, %v589_v3 }
 0x1c8   :  { %v595_v2 = vpop.permute.xlu0 %594 }
 0x1c9   :  { %v597_v4 = vmul.f32 %v595_v2, %v589_v3 }
 0x1cb   :  { %599 = vrot.lane.b32.xlu0 %v597_v4, %s1554_s10 }
 0x23d   :  { %v600_v6 = vpop.permute.xlu0 %599 }
 0x23e   :  { %v602_v50 = vadd.f32 %v600_v6, %v592_v5 }
 0x240   :  { %1463 = vtanh.f32 %v602_v50 }
 0x246   :  { %v1464_v7 = vpop.eup %1463 }
 0x247   :  { %605 = vrot.lane.b32.xlu1 %v1464_v7, %s1554_s10 }
 0x2b9   :  { %v606_v8 = vpop.permute.xlu1 %605 }
 0x2ba   :  { %v608_v9 = vmul.f32 %v606_v8, %v589_v3 }
 0x2bc   :  { %612 = vrot.lane.b32.xlu1 %v608_v9, %s1555_s11 }
 0x32e   :  { %v613_v10 = vpop.permute.xlu1 %612 }
 0x32f   :  { %1426 = vmatmul.msk.f32.vlgmr.msra.gmra.mxu3 %vm547_vm7, %v613_v10 }
 0x330   :  { %888 = vmatpush.msra.mxu3 %v1686_v18 }
 0x332   :  { %889 = vmatpush.msra.mxu3 %v1707_v19 }
 0x334   :  { %890 = vmatpush.msra.mxu3 %v1736_v23 }
 0x336   :  { %891 = vmatpush.msra.mxu3 %v1763_v37 }
 0x3b2   :  { %v633_v13 = vpop.f32.mrf.mxu3 }
 0x3b3   :  { %v636_v14 = vadd.f32 %v633_v13, %v498_v12 }
 0x3b5   :  { %1465 = vtanh.f32 %v636_v14  ;;  %v1427_v16 = vmul.f32 -1.442695, %v636_v14 }
 0x3b7   :  { %1467 = vpow2.f32 %v1427_v16 }
 0x3bb   :  { %v1466_v15 = vpop.eup %1465 }
 0x3bc   :  { %659 = vrot.lane.b32.xlu2 %v1466_v15, %s1554_s10 }
 0x3bd   :  { %v1468_v25 = vpop.eup %1467 }
 0x3be   :  { %v640_v54 = vadd.f32 1.0, %v1468_v25 }
 0x3c0   :  { %1469 = vrcp.f32 %v640_v54  ;;  %v652_v26 = vand.u32 2147483648, %v640_v54  ;;  %vm646_vm9 = vweird.f32 %v640_v54  ;;  %v650_v27 = vand.u32 2147483647, %v640_v54 }
 0x3c2   :  { %v653_v29 = vor.u32 1.1754944e-38, %v652_v26  ;;  %vm651_vm11 = vcmp.eq.f32.partialorder %v650_v27, 8.507059e+37 }
 0x3c6   :  { %v1470_v17 = vpop.eup %1469 }
 0x3c7   :  { %v642_v20 = vmul.f32 %v1470_v17, %v640_v54  ;;  %vm647_vm8 = vweird.f32 %v1470_v17 }
 0x3c8   :  { %vm648_vm10 = vmor %vm646_vm9, %vm647_vm8 }
 0x3c9   :  { %v643_v21 = vsub.f32 1.0, %v642_v20 }
 0x3cb   :  { %v644_v22 = vmul.f32 %v1470_v17, %v643_v21 }
 0x3cd   :  { %v645_v24 = vadd.f32 %v1470_v17, %v644_v22 }
 0x3cf   :  { %v649_v28 = vsel %vm648_vm10, %v1470_v17, %v645_v24 }
 0x3d0   :  { %v654_v60 = vsel %vm651_vm11, %v653_v29, %v649_v28 }
 0x3d1   :  { %v657_v33 = vmul.f32 %v654_v60, %v602_v50  ;;  %v503_v50 = vpop.f32.mrf.mxu1 }
 0x3d2   :  { %v504_v7 = vadd.f32 %v1827_v36, %v503_v50 }
 0x416   :  { %v660_v31 = vpop.permute.xlu2 %659 }
 0x417   :  { %v662_v32 = vmul.f32 %v660_v31, %v654_v60 }
 0x419   :  { %664 = vrot.lane.b32.xlu2 %v662_v32, %s1554_s10 }
 0x473   :  { %v665_v34 = vpop.permute.xlu2 %664 }
 0x474   :  { %v667_v35 = vadd.f32 %v665_v34, %v657_v33 }
 0x476   :  { %1471 = vtanh.f32 %v667_v35 }
 0x47c   :  { %v1472_v38 = vpop.eup %1471 }
 0x47d   :  { %670 = vrot.lane.b32.xlu0 %v1472_v38, %s1554_s10 }
 0x4ef   :  { %v671_v39 = vpop.permute.xlu0 %670 }
 0x4f0   :  { %v673_v40 = vmul.f32 %v671_v39, %v654_v60 }
 0x4f2   :  { %677 = vrot.lane.b32.xlu1 %v673_v40, %s1555_s11 }
 0x564   :  { %v678_v30 = vpop.permute.xlu1 %677 }
 0x565   :  { %1428 = vmatmul.msk.f32.vlgmr.msrb.gmra.mxu2 %vm547_vm7, %v678_v30 }
 0x566   :  { %953 = vmatpush.msrb.mxu2 %v1686_v18 }
 0x568   :  { %954 = vmatpush.msrb.mxu2 %v1707_v19 }
 0x56a   :  { %955 = vmatpush.msrb.mxu2 %v1736_v23 }
 0x56c   :  { %956 = vmatpush.msrb.mxu2 %v1763_v37 }
 0x5e8   :  { %v698_v46 = vpop.f32.mrf.mxu2 }
 0x5e9   :  { %v701_v47 = vadd.f32 %v698_v46, %v501_v44 }
 0x5eb   :  { %1473 = vtanh.f32 %v701_v47  ;;  %v1429_v49 = vmul.f32 -1.442695, %v701_v47 }
 0x5ed   :  { %1475 = vpow2.f32 %v1429_v49 }
 0x5f1   :  { %v1474_v48 = vpop.eup %1473 }
 0x5f2   :  { %724 = vrot.lane.b32.xlu2 %v1474_v48, %s1554_s10 }
 0x5f3   :  { %v1476_v51 = vpop.eup %1475 }
 0x5f4   :  { %v705_v43 = vadd.f32 1.0, %v1476_v51 }
 0x5f6   :  { %1477 = vrcp.f32 %v705_v43  ;;  %v717_v57 = vand.u32 2147483648, %v705_v43  ;;  %vm711_vm13 = vweird.f32 %v705_v43  ;;  %v715_v58 = vand.u32 2147483647, %v705_v43 }
 0x5f8   :  { %v718_v61 = vor.u32 1.1754944e-38, %v717_v57  ;;  %vm716_vm15 = vcmp.eq.f32.partialorder %v715_v58, 8.507059e+37 }
 0x5fc   :  { %v1478_v42 = vpop.eup %1477 }
 0x5fd   :  { %v707_v52 = vmul.f32 %v1478_v42, %v705_v43  ;;  %vm712_vm12 = vweird.f32 %v1478_v42 }
 0x5fe   :  { %vm713_vm14 = vmor %vm711_vm13, %vm712_vm12 }
 0x5ff   :  { %v708_v53 = vsub.f32 1.0, %v707_v52 }
 0x601   :  { %v709_v55 = vmul.f32 %v1478_v42, %v708_v53 }
 0x603   :  { %v710_v56 = vadd.f32 %v1478_v42, %v709_v55 }
 0x605   :  { %v714_v59 = vsel %vm713_vm14, %v1478_v42, %v710_v56 }
 0x606   :  { %v719_v62 = vsel %vm716_vm15, %v718_v61, %v714_v59 }
 0x607   :  { %v722_v0 = vmul.f32 %v719_v62, %v667_v35  ;;  %v506_v35 = vpop.f32.mrf.mxu1 }
 0x608   :  { %v507_v38 = vadd.f32 %v1827_v36, %v506_v35 }
 0x64c   :  { %v725_v45 = vpop.permute.xlu2 %724 }
 0x64d   :  { %v727_v63 = vmul.f32 %v725_v45, %v719_v62 }
 0x64f   :  { %729 = vrot.lane.b32.xlu0 %v727_v63, %s1554_s10 }
 0x6c1   :  { %v730_v1 = vpop.permute.xlu0 %729 }
 0x6c2   :  { %v732_v2 = vadd.f32 %v730_v1, %v722_v0 }
 0x6c4   :  { %1479 = vtanh.f32 %v732_v2 }
 0x6ca   :  { %v1480_v3 = vpop.eup %1479 }
 0x6cb   :  { %735 = vrot.lane.b32.xlu1 %v1480_v3, %s1554_s10 }
 0x73d   :  { %v736_v4 = vpop.permute.xlu1 %735 }
 0x73e   :  { %v738_v5 = vmul.f32 %v736_v4, %v719_v62 }
 0x740   :  { %742 = vrot.lane.b32.xlu2 %v738_v5, %s1555_s11 }
 0x79a   :  { %v743_v6 = vpop.permute.xlu2 %742 }
 0x79b   :  { %1430 = vmatmul.msk.f32.vlgmr.msrb.gmra.mxu3 %vm547_vm7, %v743_v6 }
 0x79c   :  { %1018 = vmatpush.msrb.mxu3 %v1686_v18 }
 0x79e   :  { %1019 = vmatpush.msrb.mxu3 %v1707_v19 }
 0x7a0   :  { %1020 = vmatpush.msrb.mxu3 %v1736_v23 }
 0x7a2   :  { %1021 = vmatpush.msrb.mxu3 %v1763_v37 }
 0x81e   :  { %v763_v8 = vpop.f32.mrf.mxu3 }
 0x81f   :  { %v766_v9 = vadd.f32 %v763_v8, %v504_v7 }
 0x821   :  { %1481 = vtanh.f32 %v766_v9  ;;  %v1431_v11 = vmul.f32 -1.442695, %v766_v9 }
 0x823   :  { %1483 = vpow2.f32 %v1431_v11 }
 0x827   :  { %v1482_v10 = vpop.eup %1481 }
 0x828   :  { %789 = vrot.lane.b32.xlu0 %v1482_v10, %s1554_s10 }
 0x829   :  { %v1484_v12 = vpop.eup %1483 }
 0x82a   :  { %v770_v13 = vadd.f32 1.0, %v1484_v12 }
 0x82c   :  { %1485 = vrcp.f32 %v770_v13  ;;  %v782_v17 = vand.u32 2147483648, %v770_v13  ;;  %vm776_vm1 = vweird.f32 %v770_v13  ;;  %v780_v20 = vand.u32 2147483647, %v770_v13 }
 0x82e   :  { %v783_v22 = vor.u32 1.1754944e-38, %v782_v17  ;;  %vm781_vm3 = vcmp.eq.f32.partialorder %v780_v20, 8.507059e+37 }
 0x832   :  { %v1486_v14 = vpop.eup %1485 }
 0x833   :  { %v772_v15 = vmul.f32 %v1486_v14, %v770_v13  ;;  %vm777_vm0 = vweird.f32 %v1486_v14 }
 0x834   :  { %vm778_vm2 = vmor %vm776_vm1, %vm777_vm0 }
 0x835   :  { %v773_v16 = vsub.f32 1.0, %v772_v15 }
 0x837   :  { %v774_v25 = vmul.f32 %v1486_v14, %v773_v16 }
 0x839   :  { %v775_v54 = vadd.f32 %v1486_v14, %v774_v25 }
 0x83b   :  { %v779_v21 = vsel %vm778_vm2, %v1486_v14, %v775_v54 }
 0x83c   :  { %v784_v26 = vsel %vm781_vm3, %v783_v22, %v779_v21 }
 0x83d   :  { %v787_v28 = vmul.f32 %v784_v26, %v732_v2  ;;  %v509_v2 = vpop.f32.mrf.mxu1 }
 0x83e   :  { %v510_v3 = vadd.f32 %v1827_v36, %v509_v2 }
 0x89a   :  { %v790_v24 = vpop.permute.xlu0 %789 }
 0x89b   :  { %v792_v27 = vmul.f32 %v790_v24, %v784_v26 }
 0x89d   :  { %794 = vrot.lane.b32.xlu1 %v792_v27, %s1554_s10 }
 0x90f   :  { %v795_v29 = vpop.permute.xlu1 %794 }
 0x910   :  { %v797_v31 = vadd.f32 %v795_v29, %v787_v28 }
 0x912   :  { %1487 = vtanh.f32 %v797_v31 }
 0x918   :  { %v1488_v60 = vpop.eup %1487 }
 0x919   :  { %800 = vrot.lane.b32.xlu2 %v1488_v60, %s1554_s10 }
 0x973   :  { %v801_v32 = vpop.permute.xlu2 %800 }
 0x974   :  { %v803_v33 = vmul.f32 %v801_v32, %v784_v26 }
 0x976   :  { %807 = vrot.lane.b32.xlu0 %v803_v33, %s1555_s11 }
 0x9e8   :  { %v808_v34 = vpop.permute.xlu0 %807 }
 0x9e9   :  { %1432 = vmatmul.msk.f32.vlgmr.msra.gmra.mxu2 %vm547_vm7, %v808_v34 }
 0x9ea   :  { %1083 = vmatpush.msra.mxu2 %v1686_v18 }
 0x9ec   :  { %1084 = vmatpush.msra.mxu2 %v1707_v19 }
 0x9ee   :  { %1085 = vmatpush.msra.mxu2 %v1736_v23 }
 0x9f0   :  { %1086 = vmatpush.msra.mxu2 %v1763_v37 }
 0xa6c   :  { %v828_v39 = vpop.f32.mrf.mxu2 }
 0xa6d   :  { %v831_v40 = vadd.f32 %v828_v39, %v507_v38 }
 0xa6f   :  { %1489 = vtanh.f32 %v831_v40  ;;  %v1433_v41 = vmul.f32 -1.442695, %v831_v40 }
 0xa71   :  { %1491 = vpow2.f32 %v1433_v41 }
 0xa75   :  { %v1490_v30 = vpop.eup %1489 }
 0xa76   :  { %854 = vrot.lane.b32.xlu1 %v1490_v30, %s1554_s10 }
 0xa77   :  { %v1492_v44 = vpop.eup %1491 }
 0xa78   :  { %v835_v46 = vadd.f32 1.0, %v1492_v44 }
 0xa7a   :  { %1493 = vrcp.f32 %v835_v46  ;;  %v847_v42 = vand.u32 2147483648, %v835_v46  ;;  %vm841_vm5 = vweird.f32 %v835_v46  ;;  %v845_v52 = vand.u32 2147483647, %v835_v46 }
 0xa7c   :  { %v848_v55 = vor.u32 1.1754944e-38, %v847_v42  ;;  %vm846_vm8 = vcmp.eq.f32.partialorder %v845_v52, 8.507059e+37 }
 0xa80   :  { %v1494_v47 = vpop.eup %1493 }
 0xa81   :  { %v837_v48 = vmul.f32 %v1494_v47, %v835_v46  ;;  %vm842_vm4 = vweird.f32 %v1494_v47 }
 0xa82   :  { %vm843_vm6 = vmor %vm841_vm5, %vm842_vm4 }
 0xa83   :  { %v838_v49 = vsub.f32 1.0, %v837_v48 }
 0xa85   :  { %v839_v51 = vmul.f32 %v1494_v47, %v838_v49 }
 0xa87   :  { %v840_v43 = vadd.f32 %v1494_v47, %v839_v51 }
 0xa89   :  { %v844_v53 = vsel %vm843_vm6, %v1494_v47, %v840_v43 }
 0xa8a   :  { %v849_v57 = vsel %vm846_vm8, %v848_v55, %v844_v53 }
 0xa8b   :  { %v852_v59 = vmul.f32 %v849_v57, %v797_v31  ;;  %v512_v31 = vpop.f32.mrf.mxu1 }
 0xa8c   :  { %v513_v60 = vadd.f32 %v1827_v36, %v512_v31 }
 0xae8   :  { %v855_v56 = vpop.permute.xlu1 %854 }
 0xae9   :  { %v857_v58 = vmul.f32 %v855_v56, %v849_v57 }
 0xaeb   :  { %859 = vrot.lane.b32.xlu2 %v857_v58, %s1554_s10 }
 0xb45   :  { %v860_v61 = vpop.permute.xlu2 %859 }
 0xb46   :  { %v862_v45 = vadd.f32 %v860_v61, %v852_v59 }
 0xb48   :  { %1495 = vtanh.f32 %v862_v45 }
 0xb4e   :  { %v1496_v62 = vpop.eup %1495 }
 0xb4f   :  { %865 = vrot.lane.b32.xlu0 %v1496_v62, %s1554_s10 }
 0xbc1   :  { %v866_v63 = vpop.permute.xlu0 %865 }
 0xbc2   :  { %v868_v0 = vmul.f32 %v866_v63, %v849_v57 }
 0xbc4   :  { %872 = vrot.lane.b32.xlu1 %v868_v0, %s1555_s11 }
 0xc36   :  { %v873_v1 = vpop.permute.xlu1 %872 }
 0xc37   :  { %1434 = vmatmul.msk.f32.vlgmr.msra.gmra.mxu3 %vm547_vm7, %v873_v1 }
 0xc38   :  { %1148 = vmatpush.msra.mxu3 %v1686_v18 }
 0xc3a   :  { %1149 = vmatpush.msra.mxu3 %v1707_v19 }
 0xc3c   :  { %1150 = vmatpush.msra.mxu3 %v1736_v23 }
 0xc3e   :  { %1151 = vmatpush.msra.mxu3 %v1763_v37 }
 0xcba   :  { %v893_v4 = vpop.f32.mrf.mxu3 }
 0xcbb   :  { %v896_v5 = vadd.f32 %v893_v4, %v510_v3 }
 0xcbd   :  { %1497 = vtanh.f32 %v896_v5  ;;  %v1435_v50 = vmul.f32 -1.442695, %v896_v5 }
 0xcbf   :  { %1499 = vpow2.f32 %v1435_v50 }
 0xcc3   :  { %v1498_v6 = vpop.eup %1497 }
 0xcc4   :  { %919 = vrot.lane.b32.xlu2 %v1498_v6, %s1554_s10 }
 0xcc5   :  { %v1500_v7 = vpop.eup %1499 }
 0xcc6   :  { %v900_v8 = vadd.f32 1.0, %v1500_v7 }
 0xcc8   :  { %1501 = vrcp.f32 %v900_v8  ;;  %v912_v14 = vand.u32 2147483648, %v900_v8  ;;  %vm906_vm10 = vweird.f32 %v900_v8  ;;  %v910_v15 = vand.u32 2147483647, %v900_v8 }
 0xcca   :  { %v913_v25 = vor.u32 1.1754944e-38, %v912_v14  ;;  %vm911_vm12 = vcmp.eq.f32.partialorder %v910_v15, 8.507059e+37 }
 0xcce   :  { %v1502_v9 = vpop.eup %1501 }
 0xccf   :  { %v902_v10 = vmul.f32 %v1502_v9, %v900_v8  ;;  %vm907_vm9 = vweird.f32 %v1502_v9 }
 0xcd0   :  { %vm908_vm11 = vmor %vm906_vm10, %vm907_vm9 }
 0xcd1   :  { %v903_v11 = vsub.f32 1.0, %v902_v10 }
 0xcd3   :  { %v904_v12 = vmul.f32 %v1502_v9, %v903_v11 }
 0xcd5   :  { %v905_v13 = vadd.f32 %v1502_v9, %v904_v12 }
 0xcd7   :  { %v909_v16 = vsel %vm908_vm11, %v1502_v9, %v905_v13 }
 0xcd8   :  { %v914_v17 = vsel %vm911_vm12, %v913_v25, %v909_v16 }
 0xcd9   :  { %v917_v21 = vmul.f32 %v914_v17, %v862_v45  ;;  %v515_v45 = vpop.f32.mrf.mxu1 }
 0xcda   :  { %v516_v62 = vadd.f32 %v1827_v36, %v515_v45 }
 0xd1e   :  { %v920_v54 = vpop.permute.xlu2 %919 }
 0xd1f   :  { %v922_v20 = vmul.f32 %v920_v54, %v914_v17 }
 0xd21   :  { %924 = vrot.lane.b32.xlu0 %v922_v20, %s1554_s10 }
 0xd93   :  { %v925_v22 = vpop.permute.xlu0 %924 }
 0xd94   :  { %v927_v24 = vadd.f32 %v925_v22, %v917_v21 }
 0xd96   :  { %1503 = vtanh.f32 %v927_v24 }
 0xd9c   :  { %v1504_v26 = vpop.eup %1503 }
 0xd9d   :  { %930 = vrot.lane.b32.xlu1 %v1504_v26, %s1554_s10 }
 0xe0f   :  { %v931_v27 = vpop.permute.xlu1 %930 }
 0xe10   :  { %v933_v28 = vmul.f32 %v931_v27, %v914_v17  ;;  %v518_v17 = vpop.f32.mrf.mxu1 }
 0xe11   :  { %v519_v20 = vadd.f32 %v1827_v36, %v518_v17 }
 0xe12   :  { %937 = vrot.lane.b32.xlu2 %v933_v28, %s1555_s11 }
 0xe6c   :  { %v938_v29 = vpop.permute.xlu2 %937 }
 0xe6d   :  { %1436 = vmatmul.msk.f32.vlgmr.msrb.gmra.mxu2 %vm547_vm7, %v938_v29 }
 0xe6e   :  { %1213 = vmatpush.msrb.mxu2 %v1686_v18 }
 0xe70   :  { %1214 = vmatpush.msrb.mxu2 %v1707_v19 }
 0xe72   :  { %1215 = vmatpush.msrb.mxu2 %v1736_v23 }
 0xe74   :  { %1216 = vmatpush.msrb.mxu2 %v1763_v37 }
 0xef0   :  { %v958_v32 = vpop.f32.mrf.mxu2 }
 0xef1   :  { %v961_v33 = vadd.f32 %v958_v32, %v513_v60 }
 0xef3   :  { %1505 = vtanh.f32 %v961_v33  ;;  %v1437_v35 = vmul.f32 -1.442695, %v961_v33 }
 0xef5   :  { %1507 = vpow2.f32 %v1437_v35 }
 0xef9   :  { %v1506_v34 = vpop.eup %1505 }
 0xefa   :  { %984 = vrot.lane.b32.xlu0 %v1506_v34, %s1554_s10 }
 0xefb   :  { %v1508_v38 = vpop.eup %1507 }
 0xefc   :  { %v965_v39 = vadd.f32 1.0, %v1508_v38 }
 0xefe   :  { %1509 = vrcp.f32 %v965_v39  ;;  %v977_v47 = vand.u32 2147483648, %v965_v39  ;;  %vm971_vm14 = vweird.f32 %v965_v39  ;;  %v975_v48 = vand.u32 2147483647, %v965_v39 }
 0xf00   :  { %v978_v51 = vor.u32 1.1754944e-38, %v977_v47  ;;  %vm976_vm0 = vcmp.eq.f32.partialorder %v975_v48, 8.507059e+37 }
 0xf04   :  { %v1510_v40 = vpop.eup %1509 }
 0xf05   :  { %v967_v30 = vmul.f32 %v1510_v40, %v965_v39  ;;  %vm972_vm13 = vweird.f32 %v1510_v40 }
 0xf06   :  { %vm973_vm15 = vmor %vm971_vm14, %vm972_vm13 }
 0xf07   :  { %v968_v41 = vsub.f32 1.0, %v967_v30 }
 0xf09   :  { %v969_v44 = vmul.f32 %v1510_v40, %v968_v41 }
 0xf0b   :  { %v970_v46 = vadd.f32 %v1510_v40, %v969_v44 }
 0xf0d   :  { %v974_v49 = vsel %vm973_vm15, %v1510_v40, %v970_v46 }
 0xf0e   :  { %v979_v42 = vsel %vm976_vm0, %v978_v51, %v974_v49 }
 0xf0f   :  { %v982_v53 = vmul.f32 %v979_v42, %v927_v24 }
 0xf6c   :  { %v985_v43 = vpop.permute.xlu0 %984 }
 0xf6d   :  { %v987_v52 = vmul.f32 %v985_v43, %v979_v42 }
 0xf6f   :  { %989 = vrot.lane.b32.xlu1 %v987_v52, %s1554_s10 }
 0xfe1   :  { %v990_v55 = vpop.permute.xlu1 %989 }
 0xfe2   :  { %v992_v56 = vadd.f32 %v990_v55, %v982_v53 }
 0xfe4   :  { %1511 = vtanh.f32 %v992_v56 }
 0xfea   :  { %v1512_v57 = vpop.eup %1511 }
 0xfeb   :  { %995 = vrot.lane.b32.xlu2 %v1512_v57, %s1554_s10 }
0x1045   :  { %v996_v58 = vpop.permute.xlu2 %995 }
0x1046   :  { %v998_v59 = vmul.f32 %v996_v58, %v979_v42  ;;  %v521_v42 = vpop.f32.mrf.mxu1 }
0x1047   :  { %v522_v52 = vadd.f32 %v1827_v36, %v521_v42 }
0x1048   :  { %1002 = vrot.lane.b32.xlu0 %v998_v59, %s1555_s11 }
0x10ba   :  { %v1003_v61 = vpop.permute.xlu0 %1002 }
0x10bb   :  { %1438 = vmatmul.msk.f32.vlgmr.msrb.gmra.mxu3 %vm547_vm7, %v1003_v61 }
0x10bc   :  { %1278 = vmatpush.msrb.mxu3 %v1686_v18 }
0x10be   :  { %1279 = vmatpush.msrb.mxu3 %v1707_v19 }
0x10c0   :  { %1280 = vmatpush.msrb.mxu3 %v1736_v23 }
0x10c2   :  { %1281 = vmatpush.msrb.mxu3 %v1763_v37 }
0x113e   :  { %v1023_v63 = vpop.f32.mrf.mxu3 }
0x113f   :  { %v1026_v0 = vadd.f32 %v1023_v63, %v516_v62 }
0x1141   :  { %1513 = vtanh.f32 %v1026_v0  ;;  %v1439_v2 = vmul.f32 -1.442695, %v1026_v0 }
0x1143   :  { %1515 = vpow2.f32 %v1439_v2 }
0x1147   :  { %v1514_v1 = vpop.eup %1513 }
0x1148   :  { %1049 = vrot.lane.b32.xlu1 %v1514_v1, %s1554_s10 }
0x1149   :  { %v1516_v3 = vpop.eup %1515 }
0x114a   :  { %v1030_v4 = vadd.f32 1.0, %v1516_v3 }
0x114c   :  { %1517 = vrcp.f32 %v1030_v4  ;;  %v1042_v37 = vand.u32 2147483648, %v1030_v4  ;;  %vm1036_vm2 = vweird.f32 %v1030_v4  ;;  %v1040_v50 = vand.u32 2147483647, %v1030_v4 }
0x114e   :  { %v1043_v8 = vor.u32 1.1754944e-38, %v1042_v37  ;;  %vm1041_vm4 = vcmp.eq.f32.partialorder %v1040_v50, 8.507059e+37 }
0x1152   :  { %v1518_v18 = vpop.eup %1517 }
0x1153   :  { %v1032_v19 = vmul.f32 %v1518_v18, %v1030_v4  ;;  %vm1037_vm1 = vweird.f32 %v1518_v18 }
0x1154   :  { %vm1038_vm3 = vmor %vm1036_vm2, %vm1037_vm1 }
0x1155   :  { %v1033_v5 = vsub.f32 1.0, %v1032_v19 }
0x1157   :  { %v1034_v23 = vmul.f32 %v1518_v18, %v1033_v5 }
0x1159   :  { %v1035_v6 = vadd.f32 %v1518_v18, %v1034_v23 }
0x115b   :  { %v1039_v7 = vsel %vm1038_vm3, %v1518_v18, %v1035_v6 }
0x115c   :  { %v1044_v10 = vsel %vm1041_vm4, %v1043_v8, %v1039_v7 }
0x115d   :  { %v1047_v12 = vmul.f32 %v1044_v10, %v992_v56 }
0x11ba   :  { %v1050_v9 = vpop.permute.xlu1 %1049 }
0x11bb   :  { %v1052_v11 = vmul.f32 %v1050_v9, %v1044_v10 }
0x11bd   :  { %1054 = vrot.lane.b32.xlu2 %v1052_v11, %s1554_s10 }
0x1217   :  { %v1055_v13 = vpop.permute.xlu2 %1054 }
0x1218   :  { %v1057_v14 = vadd.f32 %v1055_v13, %v1047_v12 }
0x121a   :  { %1519 = vtanh.f32 %v1057_v14 }
0x1220   :  { %v1520_v15 = vpop.eup %1519 }
0x1221   :  { %1060 = vrot.lane.b32.xlu0 %v1520_v15, %s1554_s10 }
0x1293   :  { %v1061_v16 = vpop.permute.xlu0 %1060 }
0x1294   :  { %v1063_v25 = vmul.f32 %v1061_v16, %v1044_v10  ;;  %v524_v10 = vpop.f32.mrf.mxu1 }
0x1295   :  { %v525_v11 = vadd.f32 %v1827_v36, %v524_v10 }
0x1296   :  { %1067 = vrot.lane.b32.xlu1 %v1063_v25, %s1555_s11 }
0x1308   :  { %v1068_v54 = vpop.permute.xlu1 %1067 }
0x1309   :  { %1440 = vmatmul.msk.f32.vlgmr.msra.gmra.mxu2 %vm547_vm7, %v1068_v54 }
0x138c   :  { %v1088_v21 = vpop.f32.mrf.mxu2 }
0x138d   :  { %v1091_v22 = vadd.f32 %v1088_v21, %v519_v20 }
0x138f   :  { %1521 = vtanh.f32 %v1091_v22  ;;  %v1441_v26 = vmul.f32 -1.442695, %v1091_v22 }
0x1391   :  { %1523 = vpow2.f32 %v1441_v26 }
0x1395   :  { %v1522_v24 = vpop.eup %1521 }
0x1396   :  { %1114 = vrot.lane.b32.xlu2 %v1522_v24, %s1554_s10 }
0x1397   :  { %v1524_v27 = vpop.eup %1523 }
0x1398   :  { %v1095_v28 = vadd.f32 1.0, %v1524_v27 }
0x139a   :  { %1525 = vrcp.f32 %v1095_v28  ;;  %v1107_v34 = vand.u32 2147483648, %v1095_v28  ;;  %vm1101_vm6 = vweird.f32 %v1095_v28  ;;  %v1105_v35 = vand.u32 2147483647, %v1095_v28 }
0x139c   :  { %v1108_v39 = vor.u32 1.1754944e-38, %v1107_v34  ;;  %vm1106_vm9 = vcmp.eq.f32.partialorder %v1105_v35, 8.507059e+37 }
0x13a0   :  { %v1526_v29 = vpop.eup %1525 }
0x13a1   :  { %v1097_v31 = vmul.f32 %v1526_v29, %v1095_v28  ;;  %vm1102_vm5 = vweird.f32 %v1526_v29 }
0x13a2   :  { %vm1103_vm8 = vmor %vm1101_vm6, %vm1102_vm5  ;;  %vm1342_vm6 = vcmask 7168  }
0x13a3   :  { %v1098_v60 = vsub.f32 1.0, %v1097_v31 }
0x13a5   :  { %v1099_v32 = vmul.f32 %v1526_v29, %v1098_v60 }
0x13a7   :  { %v1100_v33 = vadd.f32 %v1526_v29, %v1099_v32 }
0x13a9   :  { %v1104_v38 = vsel %vm1103_vm8, %v1526_v29, %v1100_v33 }
0x13aa   :  { %v1109_v30 = vsel %vm1106_vm9, %v1108_v39, %v1104_v38 }
0x13ab   :  { %v1112_v44 = vmul.f32 %v1109_v30, %v1057_v14 }
0x13f0   :  { %v1115_v40 = vpop.permute.xlu2 %1114 }
0x13f1   :  { %v1117_v41 = vmul.f32 %v1115_v40, %v1109_v30 }
0x13f3   :  { %1119 = vrot.lane.b32.xlu0 %v1117_v41, %s1554_s10 }
0x1465   :  { %v1120_v46 = vpop.permute.xlu0 %1119 }
0x1466   :  { %v1122_v47 = vadd.f32 %v1120_v46, %v1112_v44 }
0x1468   :  { %1527 = vtanh.f32 %v1122_v47 }
0x146e   :  { %v1528_v48 = vpop.eup %1527 }
0x146f   :  { %1125 = vrot.lane.b32.xlu1 %v1528_v48, %s1554_s10 }
0x14e1   :  { %v1126_v49 = vpop.permute.xlu1 %1125 }
0x14e2   :  { %v1128_v51 = vmul.f32 %v1126_v49, %v1109_v30  ;;  %v527_v30 = vpop.f32.mrf.mxu1 }
0x14e3   :  { %v528_v41 = vadd.f32 %v1827_v36, %v527_v30 }
0x14e4   :  { %1132 = vrot.lane.b32.xlu2 %v1128_v51, %s1555_s11 }
0x153e   :  { %v1133_v43 = vpop.permute.xlu2 %1132 }
0x153f   :  { %1442 = vmatmul.msk.f32.vlgmr.msra.gmra.mxu3 %vm547_vm7, %v1133_v43 }
0x15c2   :  { %v1153_v53 = vpop.f32.mrf.mxu3 }
0x15c3   :  { %v1156_v55 = vadd.f32 %v1153_v53, %v522_v52 }
0x15c5   :  { %1529 = vtanh.f32 %v1156_v55  ;;  %v1443_v57 = vmul.f32 -1.442695, %v1156_v55 }
0x15c7   :  { %1531 = vpow2.f32 %v1443_v57 }
0x15cb   :  { %v1530_v56 = vpop.eup %1529 }
0x15cc   :  { %1179 = vrot.lane.b32.xlu0 %v1530_v56, %s1554_s10 }
0x15cd   :  { %v1532_v58 = vpop.eup %1531 }
0x15ce   :  { %v1160_v59 = vadd.f32 1.0, %v1532_v58 }
0x15d0   :  { %1533 = vrcp.f32 %v1160_v59  ;;  %v1172_v1 = vand.u32 2147483648, %v1160_v59  ;;  %vm1166_vm11 = vweird.f32 %v1160_v59  ;;  %v1170_v2 = vand.u32 2147483647, %v1160_v59 }
0x15d2   :  { %v1173_v4 = vor.u32 1.1754944e-38, %v1172_v1  ;;  %vm1171_vm13 = vcmp.eq.f32.partialorder %v1170_v2, 8.507059e+37 }
0x15d6   :  { %v1534_v61 = vpop.eup %1533 }
0x15d7   :  { %v1162_v45 = vmul.f32 %v1534_v61, %v1160_v59  ;;  %vm1167_vm10 = vweird.f32 %v1534_v61 }
0x15d8   :  { %vm1168_vm12 = vmor %vm1166_vm11, %vm1167_vm10 }
0x15d9   :  { %v1163_v62 = vsub.f32 1.0, %v1162_v45 }
0x15db   :  { %v1164_v63 = vmul.f32 %v1534_v61, %v1163_v62  ;;  %v1455_v62 = vld [vmem:[%s1939_s1 + $0x68] ss:$0 sm:$0xff] }
0x15dd   :  { %v1165_v0 = vadd.f32 %v1534_v61, %v1164_v63 }
0x15df   :  { %v1169_v3 = vsel %vm1168_vm12, %v1534_v61, %v1165_v0 }
0x15e0   :  { %v1174_v19 = vsel %vm1171_vm13, %v1173_v4, %v1169_v3 }
0x15e1   :  { %v1177_v23 = vmul.f32 %v1174_v19, %v1122_v47 }
0x163e   :  { %v1180_v18 = vpop.permute.xlu0 %1179 }
0x163f   :  { %v1182_v5 = vmul.f32 %v1180_v18, %v1174_v19 }
0x1641   :  { %1184 = vrot.lane.b32.xlu1 %v1182_v5, %s1554_s10 }
0x16b3   :  { %v1185_v6 = vpop.permute.xlu1 %1184 }
0x16b4   :  { %v1187_v37 = vadd.f32 %v1185_v6, %v1177_v23 }
0x16b6   :  { %1535 = vtanh.f32 %v1187_v37 }
0x16bc   :  { %v1536_v50 = vpop.eup %1535 }
0x16bd   :  { %1190 = vrot.lane.b32.xlu2 %v1536_v50, %s1554_s10 }
0x1717   :  { %v1191_v7 = vpop.permute.xlu2 %1190 }
0x1718   :  { %v1193_v8 = vmul.f32 %v1191_v7, %v1174_v19 }
0x171a   :  { %1197 = vrot.lane.b32.xlu0 %v1193_v8, %s1555_s11 }
0x178c   :  { %v1198_v9 = vpop.permute.xlu0 %1197 }
0x178d   :  { %1444 = vmatmul.msk.f32.vlgmr.msrb.gmra.mxu2 %vm547_vm7, %v1198_v9 }
0x1810   :  { %v1218_v12 = vpop.f32.mrf.mxu2 }
0x1811   :  { %v1221_v13 = vadd.f32 %v1218_v12, %v525_v11 }
0x1813   :  { %1537 = vtanh.f32 %v1221_v13  ;;  %v1445_v15 = vmul.f32 -1.442695, %v1221_v13 }
0x1815   :  { %1539 = vpow2.f32 %v1445_v15 }
0x1819   :  { %v1538_v14 = vpop.eup %1537 }
0x181a   :  { %1244 = vrot.lane.b32.xlu1 %v1538_v14, %s1554_s10 }
0x181b   :  { %v1540_v16 = vpop.eup %1539 }
0x181c   :  { %v1225_v25 = vadd.f32 1.0, %v1540_v16 }
0x181e   :  { %1541 = vrcp.f32 %v1225_v25  ;;  %v1237_v24 = vand.u32 2147483648, %v1225_v25  ;;  %vm1231_vm15 = vweird.f32 %v1225_v25  ;;  %v1235_v26 = vand.u32 2147483647, %v1225_v25 }
0x1820   :  { %v1238_v28 = vor.u32 1.1754944e-38, %v1237_v24  ;;  %vm1236_vm1 = vcmp.eq.f32.partialorder %v1235_v26, 8.507059e+37 }
0x1824   :  { %v1542_v54 = vpop.eup %1541 }
0x1825   :  { %v1227_v17 = vmul.f32 %v1542_v54, %v1225_v25  ;;  %vm1232_vm14 = vweird.f32 %v1542_v54 }
0x1826   :  { %vm1233_vm0 = vmor %vm1231_vm15, %vm1232_vm14 }
0x1827   :  { %v1228_v20 = vsub.f32 1.0, %v1227_v17 }
0x1829   :  { %v1229_v21 = vmul.f32 %v1542_v54, %v1228_v20 }
0x182b   :  { %v1230_v22 = vadd.f32 %v1542_v54, %v1229_v21 }
0x182d   :  { %v1234_v27 = vsel %vm1233_vm0, %v1542_v54, %v1230_v22 }
0x182e   :  { %v1239_v31 = vsel %vm1236_vm1, %v1238_v28, %v1234_v27 }
0x182f   :  { %v1242_v32 = vmul.f32 %v1239_v31, %v1187_v37  ;;  %v1456_v37 = vld [vmem:[%s1939_s1 + $0x70] ss:$0 sm:$0xff] }
0x188c   :  { %v1245_v29 = vpop.permute.xlu1 %1244 }
0x188d   :  { %v1247_v60 = vmul.f32 %v1245_v29, %v1239_v31 }
0x188f   :  { %1249 = vrot.lane.b32.xlu2 %v1247_v60, %s1554_s10 }
0x18e9   :  { %v1250_v33 = vpop.permute.xlu2 %1249 }
0x18ea   :  { %v1252_v34 = vadd.f32 %v1250_v33, %v1242_v32 }
0x18ec   :  { %1543 = vtanh.f32 %v1252_v34 }
0x18f2   :  { %v1544_v35 = vpop.eup %1543 }
0x18f3   :  { %1255 = vrot.lane.b32.xlu0 %v1544_v35, %s1554_s10 }
0x1965   :  { %v1256_v38 = vpop.permute.xlu0 %1255 }
0x1966   :  { %v1258_v39 = vmul.f32 %v1256_v38, %v1239_v31 }
0x1968   :  { %1262 = vrot.lane.b32.xlu1 %v1258_v39, %s1555_s11 }
0x19da   :  { %v1263_v40 = vpop.permute.xlu1 %1262 }
0x19db   :  { %1446 = vmatmul.msk.f32.vlgmr.msrb.gmra.mxu3 %vm547_vm7, %v1263_v40 }
0x1a5e   :  { %v1283_v44 = vpop.f32.mrf.mxu3 }
0x1a5f   :  { %v1286_v46 = vadd.f32 %v1283_v44, %v528_v41 }
0x1a61   :  { %1545 = vtanh.f32 %v1286_v46  ;;  %v1447_v48 = vmul.f32 -1.442695, %v1286_v46 }
0x1a63   :  { %1547 = vpow2.f32 %v1447_v48 }
0x1a67   :  { %v1546_v47 = vpop.eup %1545 }
0x1a68   :  { %1309 = vrot.lane.b32.xlu2 %v1546_v47, %s1554_s10 }
0x1a69   :  { %v1548_v49 = vpop.eup %1547 }
0x1a6a   :  { %v1290_v51 = vadd.f32 1.0, %v1548_v49 }
0x1a6c   :  { %1549 = vrcp.f32 %v1290_v51  ;;  %v1302_v56 = vand.u32 2147483648, %v1290_v51  ;;  %vm1296_vm3 = vweird.f32 %v1290_v51  ;;  %v1300_v36 = vand.u32 2147483647, %v1290_v51 }
0x1a6e   :  { %v1303_v58 = vor.u32 1.1754944e-38, %v1302_v56  ;;  %vm1301_vm5 = vcmp.eq.f32.partialorder %v1300_v36, 8.507059e+37 }
0x1a70   :  { %1329 = vrot.lane.b32.xlu2 %v1455_v62, %s1555_s11 }
0x1a72   :  { %v1550_v43 = vpop.eup %1549 }
0x1a73   :  { %v1292_v42 = vmul.f32 %v1550_v43, %v1290_v51  ;;  %vm1297_vm2 = vweird.f32 %v1550_v43 }
0x1a74   :  { %vm1298_vm4 = vmor %vm1296_vm3, %vm1297_vm2 }
0x1a75   :  { %v1293_v52 = vsub.f32 1.0, %v1292_v42 }
0x1a77   :  { %v1294_v53 = vmul.f32 %v1550_v43, %v1293_v52 }
0x1a79   :  { %v1295_v55 = vadd.f32 %v1550_v43, %v1294_v53 }
0x1a7b   :  { %v1299_v57 = vsel %vm1298_vm4, %v1550_v43, %v1295_v55 }
0x1a7c   :  { %v1304_v61 = vsel %vm1301_vm5, %v1303_v58, %v1299_v57 }
0x1a7d   :  { %v1307_v63 = vmul.f32 %v1304_v61, %v1252_v34 }
0x1ac2   :  { %v1310_v59 = vpop.permute.xlu2 %1309 }
0x1ac3   :  { %v1312_v45 = vmul.f32 %v1310_v59, %v1304_v61 }
0x1ac5   :  { %1314 = vrot.lane.b32.xlu0 %v1312_v45, %s1554_s10 }
0x1aca   :  { %v1330_v18 = vpop.permute.xlu2 %1329 }
0x1b37   :  { %v1315_v0 = vpop.permute.xlu0 %1314 }
0x1b38   :  { %v1317_v1 = vadd.f32 %v1315_v0, %v1307_v63 }
0x1b3a   :  { %1551 = vtanh.f32 %v1317_v1 }
0x1b40   :  { %v1552_v2 = vpop.eup %1551 }
0x1b41   :  { %1320 = vrot.lane.b32.xlu1 %v1552_v2, %s1554_s10 }
0x1bb3   :  { %v1321_v3 = vpop.permute.xlu1 %1320 }
0x1bb4   :  { %v1323_v4 = vmul.f32 %v1321_v3, %v1304_v61 }
0x1bb6   :  { %v1326_v19 = vmax.f32 %v1323_v4, 0.0 }
0x1bb8   :  { %v1332_v5 = vmul.f32 %v1330_v18, %v1326_v19 }
0x1bba   :  { %1334 = vrot.lane.b32.xlu0 %v1332_v5, %s1555_s11 }
0x1c2c   :  { %v1335_v23 = vpop.permute.xlu0 %1334 }
0x1c2d   :  { %v1337_v6 = vsel %vm547_vm7, %v1335_v23, 0.0 }
0x1c2e   :  { %1338 = vadd.xlane.f32.xlu1 %v1337_v6 }
0x1ca1   :  { %v1339_v50 = vpop.xlane.xlu1 %1338 }
0x1ca2   :  { %v1341_v7 = vadd.f32 %v1456_v37, %v1339_v50 }
0x1ca4   :  { %1343 = vst.msk [vmem:[%s1941_s2] sm:$0xff] %vm1342_vm6, %v1341_v7 }

</bundles_post_ra>
